<compile_context>
chip_gen: v7x
topology: tpu7x:2x2x1
jax: 0.10.0
libtpu: 0.0.40
codegen_flags: <defaults>
</compile_context>

<pallas_src>
import jax
import jax.numpy as jnp
from jax.experimental import pallas as pl
from jax.experimental.pallas import tpu as pltpu

_GELU_K0 = 0.7978845608028654   # sqrt(2/pi)
_GELU_K1 = 0.044715


def _gelu(x):
    # tanh-approx GELU (EUP tanh); ~1e-3 abs from torch's exact-erf GELU.
    return 0.5 * x * (1.0 + jnp.tanh(_GELU_K0 * (x + _GELU_K1 * x * x * x)))


# ----------------------------------------------------------------------------
# One-time host-side prep (hoisted out of the forward pass).
# ----------------------------------------------------------------------------
def _interp_matrix(n_in, n_out):
    # bilinear, align_corners=True: src = dst * (n_in - 1) / (n_out - 1)
    pos = jnp.arange(n_out, dtype=jnp.float32) * (float(n_in - 1) / float(n_out - 1))
    lo = jnp.clip(jnp.floor(pos), 0, n_in - 2).astype(jnp.int32)
    frac = pos - lo.astype(jnp.float32)
    oh_lo = jax.nn.one_hot(lo, n_in, dtype=jnp.float32)
    oh_hi = jax.nn.one_hot(lo + 1, n_in, dtype=jnp.float32)
    return oh_lo * (1.0 - frac)[:, None] + oh_hi * frac[:, None]          # (n_out, n_in)


def _band_weight(w_hwio, W):
    """Block-banded weight (3, W*Cin, W*Cout) for a 3x3 conv with width zero-padding
    folded in: band[dh, wu*Cin+ci, w*Cout+co] = w[dh, wu-w+1, ci, co] iff |wu-w|<=1."""
    Cin, Cout = w_hwio.shape[2], w_hwio.shape[3]
    rel = jnp.arange(W)[:, None] - jnp.arange(W)[None, :] + 1              # wu - w + 1
    sel = (rel[:, :, None] == jnp.arange(3)[None, None, :]).astype(jnp.float32)
    band = jnp.einsum('pwd,adco->apcwo', sel, w_hwio)                      # (3,W,Cin,W,Cout)
    return band.reshape(3, W * Cin, W * Cout).astype(jnp.bfloat16)


def _tile_lane(v, W):
    # per-channel (C,) vector -> (1, W*C) lane layout (index = w*C + c)
    return jnp.tile(v.reshape(-1), W).reshape(1, -1).astype(jnp.float32)


def prepare_fused_params(params, H, W):
    """Build all kernel-ready constants once (interp matrices, banded weights,
    lane-tiled folded-BN scale/bias).  Called outside the jitted forward."""
    Ho, Wo = 2 * H, 2 * W
    C = params["rb1_w"].shape[2]
    rh = _interp_matrix(H, Ho).astype(jnp.bfloat16)                        # (Ho, H)
    rwt = _interp_matrix(W, Wo).T                                          # (W, Wo)
    # Kronecker-expanded width matrix: mexp[w*C+c, q*C+c'] = rwt[w,q] * delta(c,c')
    eye = jnp.eye(C, dtype=jnp.float32)
    mexp = (rwt[:, None, :, None] * eye[None, :, None, :]).reshape(W * C, Wo * C)
    fp = {"rh": rh, "mexp": mexp.astype(jnp.bfloat16)}
    for i, name in enumerate(("rb1", "rb2", "dc1", "dc2"), start=1):
        fp[f"w{i}"] = _band_weight(params[f"{name}_w"], Wo)
        fp[f"s{i}"] = _tile_lane(params[f"{name}_s"], Wo)
        fp[f"b{i}"] = _tile_lane(params[f"{name}_b"], Wo)
    return fp


# ----------------------------------------------------------------------------
# Fused kernel: upsample -> rb1 -> rb2(+res) -> dc1 -> dc2, one image per grid step.
# Channels-last with width*channels fused onto the lane axis throughout.
# ----------------------------------------------------------------------------
def _make_fused_kernel(H, W, C, Cmid, Cout):
    Ho, Wo = 2 * H, 2 * W

    def kernel(x_ref, rh_ref, mexp_ref,
               w1_ref, s1_ref, b1_ref,
               w2_ref, s2_ref, b2_ref,
               w3_ref, s3_ref, b3_ref,
               w4_ref, s4_ref, b4_ref,
               o_ref, xa_ref, xb_ref):
        # Zero the halo scratches once per grid step.  Interior rows are fully
        # overwritten by each conv stage, so rows 0 / Ho+1 stay zero for both stages
        # that reuse each scratch.  (No pl.when(pid==0) guard: with a "parallel" grid
        # axis each TensorCore has its own scratch and may never see pid 0.)
        xa_ref[...] = jnp.zeros_like(xa_ref)
        xb_ref[...] = jnp.zeros_like(xb_ref)

        # ---- stage 0: bilinear x2 upsample (align_corners=True) -------------------
        # Height pass batches width+channels on the lane axis; width pass uses the
        # block-diagonal Kronecker matrix so channels ride along.  bf16 MXU, f32 acc.
        th = jnp.dot(rh_ref[...], x_ref[0].astype(jnp.bfloat16),
                     preferred_element_type=jnp.float32)                  # (Ho, W*C)
        up = jnp.dot(th.astype(jnp.bfloat16), mexp_ref[...],
                     preferred_element_type=jnp.float32)                  # (Ho, Wo*C)

        def conv(xp_ref, x_val, w_ref, s_ref, b_ref, wcout, residual=None):
            # 3x3 conv (pad=1, no bias) as 3 banded bf16 matmuls + folded eval-BN.
            xp_ref[1:Ho + 1, :] = x_val                                   # interior only
            acc = jnp.zeros((Ho, wcout), jnp.float32)
            for dh in range(3):
                strip = xp_ref[dh:dh + Ho, :].astype(jnp.bfloat16)        # (Ho, Wo*Cin)
                acc = acc + jnp.dot(strip, w_ref[dh],
                                    preferred_element_type=jnp.float32)   # (Ho, Wo*Cout)
            y = acc * s_ref[...] + b_ref[...]                             # folded BN (eval)
            if residual is not None:
                y = y + residual
            return _gelu(y)

        # ---- ResBlock(C, C, mid=C//2): conv-bn-gelu ; conv-bn ; +res ; gelu -------
        h = conv(xa_ref, up, w1_ref, s1_ref, b1_ref, Wo * Cmid)
        h = conv(xb_ref, h, w2_ref, s2_ref, b2_ref, Wo * C, residual=up)
        # ---- DoubleConv(C, Cout, mid=C//2): (conv-bn-gelu) * 2 ---------------------
        h = conv(xa_ref, h, w3_ref, s3_ref, b3_ref, Wo * Cmid)
        h = conv(xb_ref, h, w4_ref, s4_ref, b4_ref, Wo * Cout)

        o_ref[0] = h.astype(o_ref.dtype)                                  # lane-dense store

    return kernel


@jax.jit
def double_up_forward(x_nchw, fp):
    N, C, H, W = x_nchw.shape
    Ho, Wo = 2 * H, 2 * W
    Cmid = fp["w1"].shape[2] // Wo
    Cout = fp["w4"].shape[2] // Wo

    # Small pre-kernel relayout to channels-last; everything downstream is fused.
    x_flat = jnp.transpose(x_nchw, (0, 2, 3, 1)).reshape(N, H, W * C)

    const2 = lambda n: (0, 0)
    const3 = lambda n: (0, 0, 0)
    in_specs = [
        pl.BlockSpec((1, H, W * C), lambda n: (n, 0, 0)),
        pl.BlockSpec((Ho, H), const2),
        pl.BlockSpec((W * C, Wo * C), const2),
    ]
    args = [x_flat, fp["rh"], fp["mexp"]]
    for i in (1, 2, 3, 4):
        in_specs += [pl.BlockSpec(fp[f"w{i}"].shape, const3),
                     pl.BlockSpec(fp[f"s{i}"].shape, const2),
                     pl.BlockSpec(fp[f"b{i}"].shape, const2)]
        args += [fp[f"w{i}"], fp[f"s{i}"], fp[f"b{i}"]]

    out = pl.pallas_call(
        _make_fused_kernel(H, W, C, Cmid, Cout),
        out_shape=jax.ShapeDtypeStruct((N, Ho, Wo * Cout), jnp.float32),
        grid=(N,),
        in_specs=in_specs,
        out_specs=pl.BlockSpec((1, Ho, Wo * Cout), lambda n: (n, 0, 0)),
        scratch_shapes=[pltpu.VMEM((Ho + 2, Wo * C), jnp.float32),     # halo, Cin=C convs
                        pltpu.VMEM((Ho + 2, Wo * Cmid), jnp.float32)], # halo, Cin=Cmid convs
        compiler_params=pltpu.CompilerParams(dimension_semantics=("parallel",)),
    )(*args)
    return jnp.transpose(out.reshape(N, Ho, Wo, Cout), (0, 3, 1, 2))


# ----------------------------------------------------------------------------
# Parameters (deterministic synthetic init, BN folded for eval).
# ----------------------------------------------------------------------------
def _fold_bn(key, c, eps=1e-5):
    kg, kb, km, kv = jax.random.split(key, 4)
    gamma = 1.0 + 0.1 * jax.random.normal(kg, (c,), jnp.float32)
    beta = 0.1 * jax.random.normal(kb, (c,), jnp.float32)
    mean = 0.1 * jax.random.normal(km, (c,), jnp.float32)
    var = 1.0 + 0.1 * jnp.abs(jax.random.normal(kv, (c,), jnp.float32))
    scale = gamma * jax.lax.rsqrt(var + eps)
    bias = beta - mean * scale
    return scale, bias


def make_double_up_params(key, in_channels, out_channels):
    mid = in_channels // 2
    ks = jax.random.split(key, 8)

    def w(k, ci, co):  # HWIO conv weight, 3x3, no bias
        return 0.1 * jax.random.normal(k, (3, 3, ci, co), jnp.float32)

    p = {}
    # ResBlock(in_channels, in_channels, mid_channels=in_channels//2)
    p["rb1_w"] = w(ks[0], in_channels, mid)
    p["rb1_s"], p["rb1_b"] = _fold_bn(ks[1], mid)
    p["rb2_w"] = w(ks[2], mid, in_channels)
    p["rb2_s"], p["rb2_b"] = _fold_bn(ks[3], in_channels)
    # DoubleConv(in_channels, out_channels, mid_channels=in_channels//2)
    p["dc1_w"] = w(ks[4], in_channels, mid)
    p["dc1_s"], p["dc1_b"] = _fold_bn(ks[5], mid)
    p["dc2_w"] = w(ks[6], mid, out_channels)
    p["dc2_s"], p["dc2_b"] = _fold_bn(ks[7], out_channels)
    return p


if __name__ == "__main__":
    N, C_IN, H, W = 2, 4, 16, 16
    C_OUT = 8

    key = jax.random.PRNGKey(0)
    kx, kp = jax.random.split(key)
    x = jax.random.normal(kx, (N, C_IN, H, W), jnp.float32)
    params = make_double_up_params(kp, C_IN, C_OUT)
    fused_params = prepare_fused_params(params, H, W)   # one-time hoisted prep

    y = double_up_forward(x, fused_params)
    y = jax.block_until_ready(y)

    assert y.shape == (N, C_OUT, 2 * H, 2 * W), y.shape
    assert bool(jnp.all(jnp.isfinite(y)))
    print("KERNEL_OK")
</pallas_src>

<mosaic_0001>
module attributes {stable_mosaic.version = 11 : i64} {
  func.func @kernel(%arg0: i32, %arg1: memref<1x16x64xf32, #tpu.memory_space<vmem>>, %arg2: memref<32x16xbf16, #tpu.memory_space<vmem>>, %arg3: memref<64x128xbf16, #tpu.memory_space<vmem>>, %arg4: memref<3x128x64xbf16, #tpu.memory_space<vmem>>, %arg5: memref<1x64xf32, #tpu.memory_space<vmem>>, %arg6: memref<1x64xf32, #tpu.memory_space<vmem>>, %arg7: memref<3x64x128xbf16, #tpu.memory_space<vmem>>, %arg8: memref<1x128xf32, #tpu.memory_space<vmem>>, %arg9: memref<1x128xf32, #tpu.memory_space<vmem>>, %arg10: memref<3x128x64xbf16, #tpu.memory_space<vmem>>, %arg11: memref<1x64xf32, #tpu.memory_space<vmem>>, %arg12: memref<1x64xf32, #tpu.memory_space<vmem>>, %arg13: memref<3x64x256xbf16, #tpu.memory_space<vmem>>, %arg14: memref<1x256xf32, #tpu.memory_space<vmem>>, %arg15: memref<1x256xf32, #tpu.memory_space<vmem>>, %arg16: memref<1x32x256xf32, #tpu.memory_space<vmem>>, %arg17: memref<34x128xf32, #tpu.memory_space<vmem>>, %arg18: memref<34x64xf32, #tpu.memory_space<vmem>>) attributes {dimension_semantics = [#tpu.dimension_semantics<parallel>], iteration_bounds = array<i64: 2>, scalar_prefetch = 0 : i64, scratch_operands = 2 : i64, tpu.core_type = #tpu.core_type<tc>, window_params = [{transform_indices = @transform_0, window_bounds = array<i64: 1, 16, 64>}, {pipeline_mode = #tpu.pipeline_mode<synchronous>, transform_indices = @transform_1, window_bounds = array<i64: 32, 16>}, {pipeline_mode = #tpu.pipeline_mode<synchronous>, transform_indices = @transform_2, window_bounds = array<i64: 64, 128>}, {pipeline_mode = #tpu.pipeline_mode<synchronous>, transform_indices = @transform_3, window_bounds = array<i64: 3, 128, 64>}, {pipeline_mode = #tpu.pipeline_mode<synchronous>, transform_indices = @transform_4, window_bounds = array<i64: 1, 64>}, {pipeline_mode = #tpu.pipeline_mode<synchronous>, transform_indices = @transform_5, window_bounds = array<i64: 1, 64>}, {pipeline_mode = #tpu.pipeline_mode<synchronous>, transform_indices = @transform_6, window_bounds = array<i64: 3, 64, 128>}, {pipeline_mode = #tpu.pipeline_mode<synchronous>, transform_indices = @transform_7, window_bounds = array<i64: 1, 128>}, {pipeline_mode = #tpu.pipeline_mode<synchronous>, transform_indices = @transform_8, window_bounds = array<i64: 1, 128>}, {pipeline_mode = #tpu.pipeline_mode<synchronous>, transform_indices = @transform_9, window_bounds = array<i64: 3, 128, 64>}, {pipeline_mode = #tpu.pipeline_mode<synchronous>, transform_indices = @transform_10, window_bounds = array<i64: 1, 64>}, {pipeline_mode = #tpu.pipeline_mode<synchronous>, transform_indices = @transform_11, window_bounds = array<i64: 1, 64>}, {pipeline_mode = #tpu.pipeline_mode<synchronous>, transform_indices = @transform_12, window_bounds = array<i64: 3, 64, 256>}, {pipeline_mode = #tpu.pipeline_mode<synchronous>, transform_indices = @transform_13, window_bounds = array<i64: 1, 256>}, {pipeline_mode = #tpu.pipeline_mode<synchronous>, transform_indices = @transform_14, window_bounds = array<i64: 1, 256>}, {transform_indices = @transform_15, window_bounds = array<i64: 1, 32, 256>}]} {
    %cst = arith.constant 0.000000e+00 : f32
    %0 = vector.broadcast %cst : f32 to vector<34x128xf32>
    %c0 = arith.constant 0 : index
    %c0_0 = arith.constant 0 : index
    %1 = vector.load %arg17[%c0, %c0_0] : memref<34x128xf32, #tpu.memory_space<vmem>>, vector<34x128xf32>
    tpu.vector_store %arg17[%c0, %c0_0], %0 {strides = array<i32>} : memref<34x128xf32, #tpu.memory_space<vmem>>, vector<34x128xf32>,
    %cst_1 = arith.constant 0.000000e+00 : f32
    %2 = vector.broadcast %cst_1 : f32 to vector<34x64xf32>
    %c0_2 = arith.constant 0 : index
    %c0_3 = arith.constant 0 : index
    %3 = vector.load %arg18[%c0_2, %c0_3] : memref<34x64xf32, #tpu.memory_space<vmem>>, vector<34x64xf32>
    tpu.vector_store %arg18[%c0_2, %c0_3], %2 {strides = array<i32>} : memref<34x64xf32, #tpu.memory_space<vmem>>, vector<34x64xf32>,
    %c0_4 = arith.constant 0 : index
    %c0_5 = arith.constant 0 : index
    %4 = vector.load %arg2[%c0_4, %c0_5] : memref<32x16xbf16, #tpu.memory_space<vmem>>, vector<32x16xbf16>
    %c0_6 = arith.constant 0 : index
    %c0_7 = arith.constant 0 : index
    %c0_8 = arith.constant 0 : index
    %5 = vector.load %arg1[%c0_6, %c0_7, %c0_8] : memref<1x16x64xf32, #tpu.memory_space<vmem>>, vector<1x16x64xf32>
    %6 = vector.shape_cast %5 : vector<1x16x64xf32> to vector<16x64xf32>
    %7 = arith.truncf %6 : vector<16x64xf32> to vector<16x64xbf16>
    %cst_9 = arith.constant dense<0.000000e+00> : vector<32x64xf32>
    %8 = tpu.matmul %4, %7, %cst_9 {dimension_numbers = #tpu.dot_dimension_numbers<[1], [0], [0], [1], [0, 0, 1, 1], [], []>} : vector<32x16xbf16>, vector<16x64xbf16>, vector<32x64xf32> -> vector<32x64xf32>
    %9 = arith.truncf %8 : vector<32x64xf32> to vector<32x64xbf16>
    %c0_10 = arith.constant 0 : index
    %c0_11 = arith.constant 0 : index
    %10 = vector.load %arg3[%c0_10, %c0_11] : memref<64x128xbf16, #tpu.memory_space<vmem>>, vector<64x128xbf16>
    %cst_12 = arith.constant dense<0.000000e+00> : vector<32x128xf32>
    %11 = tpu.matmul %9, %10, %cst_12 {dimension_numbers = #tpu.dot_dimension_numbers<[1], [0], [0], [1], [0, 0, 1, 1], [], []>} : vector<32x64xbf16>, vector<64x128xbf16>, vector<32x128xf32> -> vector<32x128xf32>
    %c1 = arith.constant 1 : index
    %c0_13 = arith.constant 0 : index
    %12 = vector.load %arg17[%c1, %c0_13] : memref<34x128xf32, #tpu.memory_space<vmem>>, vector<32x128xf32>
    tpu.vector_store %arg17[%c1, %c0_13], %11 {strides = array<i32>} : memref<34x128xf32, #tpu.memory_space<vmem>>, vector<32x128xf32>,
    %cst_14 = arith.constant 0.000000e+00 : f32
    %13 = vector.broadcast %cst_14 : f32 to vector<32x64xf32>
    %c0_15 = arith.constant 0 : index
    %c0_16 = arith.constant 0 : index
    %14 = vector.load %arg17[%c0_15, %c0_16] : memref<34x128xf32, #tpu.memory_space<vmem>>, vector<32x128xf32>
    %15 = arith.truncf %14 : vector<32x128xf32> to vector<32x128xbf16>
    %c0_17 = arith.constant 0 : index
    %c0_18 = arith.constant 0 : index
    %c0_19 = arith.constant 0 : index
    %16 = vector.load %arg4[%c0_17, %c0_18, %c0_19] : memref<3x128x64xbf16, #tpu.memory_space<vmem>>, vector<1x128x64xbf16>
    %17 = vector.shape_cast %16 : vector<1x128x64xbf16> to vector<128x64xbf16>
    %cst_20 = arith.constant dense<0.000000e+00> : vector<32x64xf32>
    %18 = tpu.matmul %15, %17, %cst_20 {dimension_numbers = #tpu.dot_dimension_numbers<[1], [0], [0], [1], [0, 0, 1, 1], [], []>} : vector<32x128xbf16>, vector<128x64xbf16>, vector<32x64xf32> -> vector<32x64xf32>
    %19 = arith.addf %13, %18 : vector<32x64xf32>
    %c1_21 = arith.constant 1 : index
    %c0_22 = arith.constant 0 : index
    %20 = vector.load %arg17[%c1_21, %c0_22] : memref<34x128xf32, #tpu.memory_space<vmem>>, vector<32x128xf32>
    %21 = arith.truncf %20 : vector<32x128xf32> to vector<32x128xbf16>
    %c1_23 = arith.constant 1 : index
    %c0_24 = arith.constant 0 : index
    %c0_25 = arith.constant 0 : index
    %22 = vector.load %arg4[%c1_23, %c0_24, %c0_25] : memref<3x128x64xbf16, #tpu.memory_space<vmem>>, vector<1x128x64xbf16>
    %23 = vector.shape_cast %22 : vector<1x128x64xbf16> to vector<128x64xbf16>
    %cst_26 = arith.constant dense<0.000000e+00> : vector<32x64xf32>
    %24 = tpu.matmul %21, %23, %cst_26 {dimension_numbers = #tpu.dot_dimension_numbers<[1], [0], [0], [1], [0, 0, 1, 1], [], []>} : vector<32x128xbf16>, vector<128x64xbf16>, vector<32x64xf32> -> vector<32x64xf32>
    %25 = arith.addf %19, %24 : vector<32x64xf32>
    %c2 = arith.constant 2 : index
    %c0_27 = arith.constant 0 : index
    %26 = vector.load %arg17[%c2, %c0_27] : memref<34x128xf32, #tpu.memory_space<vmem>>, vector<32x128xf32>
    %27 = arith.truncf %26 : vector<32x128xf32> to vector<32x128xbf16>
    %c2_28 = arith.constant 2 : index
    %c0_29 = arith.constant 0 : index
    %c0_30 = arith.constant 0 : index
    %28 = vector.load %arg4[%c2_28, %c0_29, %c0_30] : memref<3x128x64xbf16, #tpu.memory_space<vmem>>, vector<1x128x64xbf16>
    %29 = vector.shape_cast %28 : vector<1x128x64xbf16> to vector<128x64xbf16>
    %cst_31 = arith.constant dense<0.000000e+00> : vector<32x64xf32>
    %30 = tpu.matmul %27, %29, %cst_31 {dimension_numbers = #tpu.dot_dimension_numbers<[1], [0], [0], [1], [0, 0, 1, 1], [], []>} : vector<32x128xbf16>, vector<128x64xbf16>, vector<32x64xf32> -> vector<32x64xf32>
    %31 = arith.addf %25, %30 : vector<32x64xf32>
    %c0_32 = arith.constant 0 : index
    %c0_33 = arith.constant 0 : index
    %32 = vector.load %arg5[%c0_32, %c0_33] : memref<1x64xf32, #tpu.memory_space<vmem>>, vector<1x64xf32>
    %33 = vector.broadcast %32 : vector<1x64xf32> to vector<32x64xf32>
    %34 = arith.mulf %31, %33 : vector<32x64xf32>
    %c0_34 = arith.constant 0 : index
    %c0_35 = arith.constant 0 : index
    %35 = vector.load %arg6[%c0_34, %c0_35] : memref<1x64xf32, #tpu.memory_space<vmem>>, vector<1x64xf32>
    %36 = vector.broadcast %35 : vector<1x64xf32> to vector<32x64xf32>
    %37 = arith.addf %34, %36 : vector<32x64xf32>
    %cst_36 = arith.constant 5.000000e-01 : f32
    %38 = vector.broadcast %cst_36 : f32 to vector<32x64xf32>
    %39 = arith.mulf %38, %37 : vector<32x64xf32>
    %cst_37 = arith.constant 4.471500e-02 : f32
    %40 = vector.broadcast %cst_37 : f32 to vector<32x64xf32>
    %41 = arith.mulf %40, %37 : vector<32x64xf32>
    %42 = arith.mulf %41, %37 : vector<32x64xf32>
    %43 = arith.mulf %42, %37 : vector<32x64xf32>
    %44 = arith.addf %37, %43 : vector<32x64xf32>
    %cst_38 = arith.constant 0.797884583 : f32
    %45 = vector.broadcast %cst_38 : f32 to vector<32x64xf32>
    %46 = arith.mulf %45, %44 : vector<32x64xf32>
    %47 = math.tanh %46 : vector<32x64xf32>
    %cst_39 = arith.constant 1.000000e+00 : f32
    %48 = vector.broadcast %cst_39 : f32 to vector<32x64xf32>
    %49 = arith.addf %48, %47 : vector<32x64xf32>
    %50 = arith.mulf %39, %49 : vector<32x64xf32>
    %c1_40 = arith.constant 1 : index
    %c0_41 = arith.constant 0 : index
    %51 = vector.load %arg18[%c1_40, %c0_41] : memref<34x64xf32, #tpu.memory_space<vmem>>, vector<32x64xf32>
    tpu.vector_store %arg18[%c1_40, %c0_41], %50 {strides = array<i32>} : memref<34x64xf32, #tpu.memory_space<vmem>>, vector<32x64xf32>,
    %cst_42 = arith.constant 0.000000e+00 : f32
    %52 = vector.broadcast %cst_42 : f32 to vector<32x128xf32>
    %c0_43 = arith.constant 0 : index
    %c0_44 = arith.constant 0 : index
    %53 = vector.load %arg18[%c0_43, %c0_44] : memref<34x64xf32, #tpu.memory_space<vmem>>, vector<32x64xf32>
    %54 = arith.truncf %53 : vector<32x64xf32> to vector<32x64xbf16>
    %c0_45 = arith.constant 0 : index
    %c0_46 = arith.constant 0 : index
    %c0_47 = arith.constant 0 : index
    %55 = vector.load %arg7[%c0_45, %c0_46, %c0_47] : memref<3x64x128xbf16, #tpu.memory_space<vmem>>, vector<1x64x128xbf16>
    %56 = vector.shape_cast %55 : vector<1x64x128xbf16> to vector<64x128xbf16>
    %cst_48 = arith.constant dense<0.000000e+00> : vector<32x128xf32>
    %57 = tpu.matmul %54, %56, %cst_48 {dimension_numbers = #tpu.dot_dimension_numbers<[1], [0], [0], [1], [0, 0, 1, 1], [], []>} : vector<32x64xbf16>, vector<64x128xbf16>, vector<32x128xf32> -> vector<32x128xf32>
    %58 = arith.addf %52, %57 : vector<32x128xf32>
    %c1_49 = arith.constant 1 : index
    %c0_50 = arith.constant 0 : index
    %59 = vector.load %arg18[%c1_49, %c0_50] : memref<34x64xf32, #tpu.memory_space<vmem>>, vector<32x64xf32>
    %60 = arith.truncf %59 : vector<32x64xf32> to vector<32x64xbf16>
    %c1_51 = arith.constant 1 : index
    %c0_52 = arith.constant 0 : index
    %c0_53 = arith.constant 0 : index
    %61 = vector.load %arg7[%c1_51, %c0_52, %c0_53] : memref<3x64x128xbf16, #tpu.memory_space<vmem>>, vector<1x64x128xbf16>
    %62 = vector.shape_cast %61 : vector<1x64x128xbf16> to vector<64x128xbf16>
    %cst_54 = arith.constant dense<0.000000e+00> : vector<32x128xf32>
    %63 = tpu.matmul %60, %62, %cst_54 {dimension_numbers = #tpu.dot_dimension_numbers<[1], [0], [0], [1], [0, 0, 1, 1], [], []>} : vector<32x64xbf16>, vector<64x128xbf16>, vector<32x128xf32> -> vector<32x128xf32>
    %64 = arith.addf %58, %63 : vector<32x128xf32>
    %c2_55 = arith.constant 2 : index
    %c0_56 = arith.constant 0 : index
    %65 = vector.load %arg18[%c2_55, %c0_56] : memref<34x64xf32, #tpu.memory_space<vmem>>, vector<32x64xf32>
    %66 = arith.truncf %65 : vector<32x64xf32> to vector<32x64xbf16>
    %c2_57 = arith.constant 2 : index
    %c0_58 = arith.constant 0 : index
    %c0_59 = arith.constant 0 : index
    %67 = vector.load %arg7[%c2_57, %c0_58, %c0_59] : memref<3x64x128xbf16, #tpu.memory_space<vmem>>, vector<1x64x128xbf16>
    %68 = vector.shape_cast %67 : vector<1x64x128xbf16> to vector<64x128xbf16>
    %cst_60 = arith.constant dense<0.000000e+00> : vector<32x128xf32>
    %69 = tpu.matmul %66, %68, %cst_60 {dimension_numbers = #tpu.dot_dimension_numbers<[1], [0], [0], [1], [0, 0, 1, 1], [], []>} : vector<32x64xbf16>, vector<64x128xbf16>, vector<32x128xf32> -> vector<32x128xf32>
    %70 = arith.addf %64, %69 : vector<32x128xf32>
    %c0_61 = arith.constant 0 : index
    %c0_62 = arith.constant 0 : index
    %71 = vector.load %arg8[%c0_61, %c0_62] : memref<1x128xf32, #tpu.memory_space<vmem>>, vector<1x128xf32>
    %72 = vector.broadcast %71 : vector<1x128xf32> to vector<32x128xf32>
    %73 = arith.mulf %70, %72 : vector<32x128xf32>
    %c0_63 = arith.constant 0 : index
    %c0_64 = arith.constant 0 : index
    %74 = vector.load %arg9[%c0_63, %c0_64] : memref<1x128xf32, #tpu.memory_space<vmem>>, vector<1x128xf32>
    %75 = vector.broadcast %74 : vector<1x128xf32> to vector<32x128xf32>
    %76 = arith.addf %73, %75 : vector<32x128xf32>
    %77 = arith.addf %76, %11 : vector<32x128xf32>
    %cst_65 = arith.constant 5.000000e-01 : f32
    %78 = vector.broadcast %cst_65 : f32 to vector<32x128xf32>
    %79 = arith.mulf %78, %77 : vector<32x128xf32>
    %cst_66 = arith.constant 4.471500e-02 : f32
    %80 = vector.broadcast %cst_66 : f32 to vector<32x128xf32>
    %81 = arith.mulf %80, %77 : vector<32x128xf32>
    %82 = arith.mulf %81, %77 : vector<32x128xf32>
    %83 = arith.mulf %82, %77 : vector<32x128xf32>
    %84 = arith.addf %77, %83 : vector<32x128xf32>
    %cst_67 = arith.constant 0.797884583 : f32
    %85 = vector.broadcast %cst_67 : f32 to vector<32x128xf32>
    %86 = arith.mulf %85, %84 : vector<32x128xf32>
    %87 = math.tanh %86 : vector<32x128xf32>
    %cst_68 = arith.constant 1.000000e+00 : f32
    %88 = vector.broadcast %cst_68 : f32 to vector<32x128xf32>
    %89 = arith.addf %88, %87 : vector<32x128xf32>
    %90 = arith.mulf %79, %89 : vector<32x128xf32>
    %c1_69 = arith.constant 1 : index
    %c0_70 = arith.constant 0 : index
    %91 = vector.load %arg17[%c1_69, %c0_70] : memref<34x128xf32, #tpu.memory_space<vmem>>, vector<32x128xf32>
    tpu.vector_store %arg17[%c1_69, %c0_70], %90 {strides = array<i32>} : memref<34x128xf32, #tpu.memory_space<vmem>>, vector<32x128xf32>,
    %cst_71 = arith.constant 0.000000e+00 : f32
    %92 = vector.broadcast %cst_71 : f32 to vector<32x64xf32>
    %c0_72 = arith.constant 0 : index
    %c0_73 = arith.constant 0 : index
    %93 = vector.load %arg17[%c0_72, %c0_73] : memref<34x128xf32, #tpu.memory_space<vmem>>, vector<32x128xf32>
    %94 = arith.truncf %93 : vector<32x128xf32> to vector<32x128xbf16>
    %c0_74 = arith.constant 0 : index
    %c0_75 = arith.constant 0 : index
    %c0_76 = arith.constant 0 : index
    %95 = vector.load %arg10[%c0_74, %c0_75, %c0_76] : memref<3x128x64xbf16, #tpu.memory_space<vmem>>, vector<1x128x64xbf16>
    %96 = vector.shape_cast %95 : vector<1x128x64xbf16> to vector<128x64xbf16>
    %cst_77 = arith.constant dense<0.000000e+00> : vector<32x64xf32>
    %97 = tpu.matmul %94, %96, %cst_77 {dimension_numbers = #tpu.dot_dimension_numbers<[1], [0], [0], [1], [0, 0, 1, 1], [], []>} : vector<32x128xbf16>, vector<128x64xbf16>, vector<32x64xf32> -> vector<32x64xf32>
    %98 = arith.addf %92, %97 : vector<32x64xf32>
    %c1_78 = arith.constant 1 : index
    %c0_79 = arith.constant 0 : index
    %99 = vector.load %arg17[%c1_78, %c0_79] : memref<34x128xf32, #tpu.memory_space<vmem>>, vector<32x128xf32>
    %100 = arith.truncf %99 : vector<32x128xf32> to vector<32x128xbf16>
    %c1_80 = arith.constant 1 : index
    %c0_81 = arith.constant 0 : index
    %c0_82 = arith.constant 0 : index
    %101 = vector.load %arg10[%c1_80, %c0_81, %c0_82] : memref<3x128x64xbf16, #tpu.memory_space<vmem>>, vector<1x128x64xbf16>
    %102 = vector.shape_cast %101 : vector<1x128x64xbf16> to vector<128x64xbf16>
    %cst_83 = arith.constant dense<0.000000e+00> : vector<32x64xf32>
    %103 = tpu.matmul %100, %102, %cst_83 {dimension_numbers = #tpu.dot_dimension_numbers<[1], [0], [0], [1], [0, 0, 1, 1], [], []>} : vector<32x128xbf16>, vector<128x64xbf16>, vector<32x64xf32> -> vector<32x64xf32>
    %104 = arith.addf %98, %103 : vector<32x64xf32>
    %c2_84 = arith.constant 2 : index
    %c0_85 = arith.constant 0 : index
    %105 = vector.load %arg17[%c2_84, %c0_85] : memref<34x128xf32, #tpu.memory_space<vmem>>, vector<32x128xf32>
    %106 = arith.truncf %105 : vector<32x128xf32> to vector<32x128xbf16>
    %c2_86 = arith.constant 2 : index
    %c0_87 = arith.constant 0 : index
    %c0_88 = arith.constant 0 : index
    %107 = vector.load %arg10[%c2_86, %c0_87, %c0_88] : memref<3x128x64xbf16, #tpu.memory_space<vmem>>, vector<1x128x64xbf16>
    %108 = vector.shape_cast %107 : vector<1x128x64xbf16> to vector<128x64xbf16>
    %cst_89 = arith.constant dense<0.000000e+00> : vector<32x64xf32>
    %109 = tpu.matmul %106, %108, %cst_89 {dimension_numbers = #tpu.dot_dimension_numbers<[1], [0], [0], [1], [0, 0, 1, 1], [], []>} : vector<32x128xbf16>, vector<128x64xbf16>, vector<32x64xf32> -> vector<32x64xf32>
    %110 = arith.addf %104, %109 : vector<32x64xf32>
    %c0_90 = arith.constant 0 : index
    %c0_91 = arith.constant 0 : index
    %111 = vector.load %arg11[%c0_90, %c0_91] : memref<1x64xf32, #tpu.memory_space<vmem>>, vector<1x64xf32>
    %112 = vector.broadcast %111 : vector<1x64xf32> to vector<32x64xf32>
    %113 = arith.mulf %110, %112 : vector<32x64xf32>
    %c0_92 = arith.constant 0 : index
    %c0_93 = arith.constant 0 : index
    %114 = vector.load %arg12[%c0_92, %c0_93] : memref<1x64xf32, #tpu.memory_space<vmem>>, vector<1x64xf32>
    %115 = vector.broadcast %114 : vector<1x64xf32> to vector<32x64xf32>
    %116 = arith.addf %113, %115 : vector<32x64xf32>
    %cst_94 = arith.constant 5.000000e-01 : f32
    %117 = vector.broadcast %cst_94 : f32 to vector<32x64xf32>
    %118 = arith.mulf %117, %116 : vector<32x64xf32>
    %cst_95 = arith.constant 4.471500e-02 : f32
    %119 = vector.broadcast %cst_95 : f32 to vector<32x64xf32>
    %120 = arith.mulf %119, %116 : vector<32x64xf32>
    %121 = arith.mulf %120, %116 : vector<32x64xf32>
    %122 = arith.mulf %121, %116 : vector<32x64xf32>
    %123 = arith.addf %116, %122 : vector<32x64xf32>
    %cst_96 = arith.constant 0.797884583 : f32
    %124 = vector.broadcast %cst_96 : f32 to vector<32x64xf32>
    %125 = arith.mulf %124, %123 : vector<32x64xf32>
    %126 = math.tanh %125 : vector<32x64xf32>
    %cst_97 = arith.constant 1.000000e+00 : f32
    %127 = vector.broadcast %cst_97 : f32 to vector<32x64xf32>
    %128 = arith.addf %127, %126 : vector<32x64xf32>
    %129 = arith.mulf %118, %128 : vector<32x64xf32>
    %c1_98 = arith.constant 1 : index
    %c0_99 = arith.constant 0 : index
    %130 = vector.load %arg18[%c1_98, %c0_99] : memref<34x64xf32, #tpu.memory_space<vmem>>, vector<32x64xf32>
    tpu.vector_store %arg18[%c1_98, %c0_99], %129 {strides = array<i32>} : memref<34x64xf32, #tpu.memory_space<vmem>>, vector<32x64xf32>,
    %cst_100 = arith.constant 0.000000e+00 : f32
    %131 = vector.broadcast %cst_100 : f32 to vector<32x256xf32>
    %c0_101 = arith.constant 0 : index
    %c0_102 = arith.constant 0 : index
    %132 = vector.load %arg18[%c0_101, %c0_102] : memref<34x64xf32, #tpu.memory_space<vmem>>, vector<32x64xf32>
    %133 = arith.truncf %132 : vector<32x64xf32> to vector<32x64xbf16>
    %c0_103 = arith.constant 0 : index
    %c0_104 = arith.constant 0 : index
    %c0_105 = arith.constant 0 : index
    %134 = vector.load %arg13[%c0_103, %c0_104, %c0_105] : memref<3x64x256xbf16, #tpu.memory_space<vmem>>, vector<1x64x256xbf16>
    %135 = vector.shape_cast %134 : vector<1x64x256xbf16> to vector<64x256xbf16>
    %cst_106 = arith.constant dense<0.000000e+00> : vector<32x256xf32>
    %136 = tpu.matmul %133, %135, %cst_106 {dimension_numbers = #tpu.dot_dimension_numbers<[1], [0], [0], [1], [0, 0, 1, 1], [], []>} : vector<32x64xbf16>, vector<64x256xbf16>, vector<32x256xf32> -> vector<32x256xf32>
    %137 = arith.addf %131, %136 : vector<32x256xf32>
    %c1_107 = arith.constant 1 : index
    %c0_108 = arith.constant 0 : index
    %138 = vector.load %arg18[%c1_107, %c0_108] : memref<34x64xf32, #tpu.memory_space<vmem>>, vector<32x64xf32>
    %139 = arith.truncf %138 : vector<32x64xf32> to vector<32x64xbf16>
    %c1_109 = arith.constant 1 : index
    %c0_110 = arith.constant 0 : index
    %c0_111 = arith.constant 0 : index
    %140 = vector.load %arg13[%c1_109, %c0_110, %c0_111] : memref<3x64x256xbf16, #tpu.memory_space<vmem>>, vector<1x64x256xbf16>
    %141 = vector.shape_cast %140 : vector<1x64x256xbf16> to vector<64x256xbf16>
    %cst_112 = arith.constant dense<0.000000e+00> : vector<32x256xf32>
    %142 = tpu.matmul %139, %141, %cst_112 {dimension_numbers = #tpu.dot_dimension_numbers<[1], [0], [0], [1], [0, 0, 1, 1], [], []>} : vector<32x64xbf16>, vector<64x256xbf16>, vector<32x256xf32> -> vector<32x256xf32>
    %143 = arith.addf %137, %142 : vector<32x256xf32>
    %c2_113 = arith.constant 2 : index
    %c0_114 = arith.constant 0 : index
    %144 = vector.load %arg18[%c2_113, %c0_114] : memref<34x64xf32, #tpu.memory_space<vmem>>, vector<32x64xf32>
    %145 = arith.truncf %144 : vector<32x64xf32> to vector<32x64xbf16>
    %c2_115 = arith.constant 2 : index
    %c0_116 = arith.constant 0 : index
    %c0_117 = arith.constant 0 : index
    %146 = vector.load %arg13[%c2_115, %c0_116, %c0_117] : memref<3x64x256xbf16, #tpu.memory_space<vmem>>, vector<1x64x256xbf16>
    %147 = vector.shape_cast %146 : vector<1x64x256xbf16> to vector<64x256xbf16>
    %cst_118 = arith.constant dense<0.000000e+00> : vector<32x256xf32>
    %148 = tpu.matmul %145, %147, %cst_118 {dimension_numbers = #tpu.dot_dimension_numbers<[1], [0], [0], [1], [0, 0, 1, 1], [], []>} : vector<32x64xbf16>, vector<64x256xbf16>, vector<32x256xf32> -> vector<32x256xf32>
    %149 = arith.addf %143, %148 : vector<32x256xf32>
    %c0_119 = arith.constant 0 : index
    %c0_120 = arith.constant 0 : index
    %150 = vector.load %arg14[%c0_119, %c0_120] : memref<1x256xf32, #tpu.memory_space<vmem>>, vector<1x256xf32>
    %151 = vector.broadcast %150 : vector<1x256xf32> to vector<32x256xf32>
    %152 = arith.mulf %149, %151 : vector<32x256xf32>
    %c0_121 = arith.constant 0 : index
    %c0_122 = arith.constant 0 : index
    %153 = vector.load %arg15[%c0_121, %c0_122] : memref<1x256xf32, #tpu.memory_space<vmem>>, vector<1x256xf32>
    %154 = vector.broadcast %153 : vector<1x256xf32> to vector<32x256xf32>
    %155 = arith.addf %152, %154 : vector<32x256xf32>
    %cst_123 = arith.constant 5.000000e-01 : f32
    %156 = vector.broadcast %cst_123 : f32 to vector<32x256xf32>
    %157 = arith.mulf %156, %155 : vector<32x256xf32>
    %cst_124 = arith.constant 4.471500e-02 : f32
    %158 = vector.broadcast %cst_124 : f32 to vector<32x256xf32>
    %159 = arith.mulf %158, %155 : vector<32x256xf32>
    %160 = arith.mulf %159, %155 : vector<32x256xf32>
    %161 = arith.mulf %160, %155 : vector<32x256xf32>
    %162 = arith.addf %155, %161 : vector<32x256xf32>
    %cst_125 = arith.constant 0.797884583 : f32
    %163 = vector.broadcast %cst_125 : f32 to vector<32x256xf32>
    %164 = arith.mulf %163, %162 : vector<32x256xf32>
    %165 = math.tanh %164 : vector<32x256xf32>
    %cst_126 = arith.constant 1.000000e+00 : f32
    %166 = vector.broadcast %cst_126 : f32 to vector<32x256xf32>
    %167 = arith.addf %166, %165 : vector<32x256xf32>
    %168 = arith.mulf %157, %167 : vector<32x256xf32>
    %c0_127 = arith.constant 0 : index
    %c0_128 = arith.constant 0 : index
    %c0_129 = arith.constant 0 : index
    %169 = vector.load %arg16[%c0_127, %c0_128, %c0_129] : memref<1x32x256xf32, #tpu.memory_space<vmem>>, vector<1x32x256xf32>
    %170 = vector.shape_cast %169 : vector<1x32x256xf32> to vector<32x256xf32>
    %171 = vector.shape_cast %168 : vector<32x256xf32> to vector<1x32x256xf32>
    tpu.vector_store %arg16[%c0_127, %c0_128, %c0_129], %171 {strides = array<i32>} : memref<1x32x256xf32, #tpu.memory_space<vmem>>, vector<1x32x256xf32>,
    return
  }
  func.func @transform_0(%arg0: i32) -> (i32, i32, i32) {
    %c0_i32 = arith.constant 0 : i32
    %c0_i32_0 = arith.constant 0 : i32
    %c0_i32_1 = arith.constant 0 : i32
    return %arg0, %c0_i32, %c0_i32_0 : i32, i32, i32
  }
  func.func @transform_1(%arg0: i32) -> (i32, i32) {
    %c0_i32 = arith.constant 0 : i32
    %c0_i32_0 = arith.constant 0 : i32
    %c0_i32_1 = arith.constant 0 : i32
    return %c0_i32, %c0_i32_0 : i32, i32
  }
  func.func @transform_2(%arg0: i32) -> (i32, i32) {
    %c0_i32 = arith.constant 0 : i32
    %c0_i32_0 = arith.constant 0 : i32
    %c0_i32_1 = arith.constant 0 : i32
    return %c0_i32, %c0_i32_0 : i32, i32
  }
  func.func @transform_3(%arg0: i32) -> (i32, i32, i32) {
    %c0_i32 = arith.constant 0 : i32
    %c0_i32_0 = arith.constant 0 : i32
    %c0_i32_1 = arith.constant 0 : i32
    %c0_i32_2 = arith.constant 0 : i32
    return %c0_i32, %c0_i32_0, %c0_i32_1 : i32, i32, i32
  }
  func.func @transform_4(%arg0: i32) -> (i32, i32) {
    %c0_i32 = arith.constant 0 : i32
    %c0_i32_0 = arith.constant 0 : i32
    %c0_i32_1 = arith.constant 0 : i32
    return %c0_i32, %c0_i32_0 : i32, i32
  }
  func.func @transform_5(%arg0: i32) -> (i32, i32) {
    %c0_i32 = arith.constant 0 : i32
    %c0_i32_0 = arith.constant 0 : i32
    %c0_i32_1 = arith.constant 0 : i32
    return %c0_i32, %c0_i32_0 : i32, i32
  }
  func.func @transform_6(%arg0: i32) -> (i32, i32, i32) {
    %c0_i32 = arith.constant 0 : i32
    %c0_i32_0 = arith.constant 0 : i32
    %c0_i32_1 = arith.constant 0 : i32
    %c0_i32_2 = arith.constant 0 : i32
    return %c0_i32, %c0_i32_0, %c0_i32_1 : i32, i32, i32
  }
  func.func @transform_7(%arg0: i32) -> (i32, i32) {
    %c0_i32 = arith.constant 0 : i32
    %c0_i32_0 = arith.constant 0 : i32
    %c0_i32_1 = arith.constant 0 : i32
    return %c0_i32, %c0_i32_0 : i32, i32
  }
  func.func @transform_8(%arg0: i32) -> (i32, i32) {
    %c0_i32 = arith.constant 0 : i32
    %c0_i32_0 = arith.constant 0 : i32
    %c0_i32_1 = arith.constant 0 : i32
    return %c0_i32, %c0_i32_0 : i32, i32
  }
  func.func @transform_9(%arg0: i32) -> (i32, i32, i32) {
    %c0_i32 = arith.constant 0 : i32
    %c0_i32_0 = arith.constant 0 : i32
    %c0_i32_1 = arith.constant 0 : i32
    %c0_i32_2 = arith.constant 0 : i32
    return %c0_i32, %c0_i32_0, %c0_i32_1 : i32, i32, i32
  }
  func.func @transform_10(%arg0: i32) -> (i32, i32) {
    %c0_i32 = arith.constant 0 : i32
    %c0_i32_0 = arith.constant 0 : i32
    %c0_i32_1 = arith.constant 0 : i32
    return %c0_i32, %c0_i32_0 : i32, i32
  }
  func.func @transform_11(%arg0: i32) -> (i32, i32) {
    %c0_i32 = arith.constant 0 : i32
    %c0_i32_0 = arith.constant 0 : i32
    %c0_i32_1 = arith.constant 0 : i32
    return %c0_i32, %c0_i32_0 : i32, i32
  }
  func.func @transform_12(%arg0: i32) -> (i32, i32, i32) {
    %c0_i32 = arith.constant 0 : i32
    %c0_i32_0 = arith.constant 0 : i32
    %c0_i32_1 = arith.constant 0 : i32
    %c0_i32_2 = arith.constant 0 : i32
    return %c0_i32, %c0_i32_0, %c0_i32_1 : i32, i32, i32
  }
  func.func @transform_13(%arg0: i32) -> (i32, i32) {
    %c0_i32 = arith.constant 0 : i32
    %c0_i32_0 = arith.constant 0 : i32
    %c0_i32_1 = arith.constant 0 : i32
    return %c0_i32, %c0_i32_0 : i32, i32
  }
  func.func @transform_14(%arg0: i32) -> (i32, i32) {
    %c0_i32 = arith.constant 0 : i32
    %c0_i32_0 = arith.constant 0 : i32
    %c0_i32_1 = arith.constant 0 : i32
    return %c0_i32, %c0_i32_0 : i32, i32
  }
  func.func @transform_15(%arg0: i32) -> (i32, i32, i32) {
    %c0_i32 = arith.constant 0 : i32
    %c0_i32_0 = arith.constant 0 : i32
    %c0_i32_1 = arith.constant 0 : i32
    return %arg0, %c0_i32, %c0_i32_0 : i32, i32, i32
  }
}

</mosaic_0001>

<bundles_post_ra>
// kernel: double_up_forward.1
= control target key start
LH: loop header
LB: loop body
LE: loop exit
PB: predicated region body
PF: predicated region fallthrough
CT: control target
= control target key end

     0   :  { %s3163_s18 = smov 0   ;;  %s3602_s0 = inlined_call_operand.vmem [shape: f32[2,16,64], index: 0, kind: input, shape index: {}]   ;;  %s3603_s1 = inlined_call_operand.vmem [shape: bf16[32,16], index: 1, kind: input, shape index: {}]   ;;  %s3604_s2 = inlined_call_operand.vmem [shape: bf16[64,128], index: 2, kind: input, shape index: {}]   ;;  %s3605_s3 = inlined_call_operand.vmem [shape: bf16[3,128,64], index: 3, kind: input, shape index: {}]   ;;  %s3606_s4 = inlined_call_operand.vmem [shape: f32[1,64], index: 4, kind: input, shape index: {}]   ;;  %s3607_s5 = inlined_call_operand.vmem [shape: f32[1,64], index: 5, kind: input, shape index: {}]   ;;  %s3608_s6 = inlined_call_operand.vmem [shape: bf16[3,64,128], index: 6, kind: input, shape index: {}]   ;;  %s3609_s7 = inlined_call_operand.vmem [shape: f32[1,128], index: 7, kind: input, shape index: {}]   ;;  %s3610_s8 = inlined_call_operand.vmem [shape: f32[1,128], index: 8, kind: input, shape index: {}]   ;;  %s3611_s9 = inlined_call_operand.vmem [shape: bf16[3,128,64], index: 9, kind: input, shape index: {}]   ;;  %s3612_s10 = inlined_call_operand.vmem [shape: f32[1,64], index: 10, kind: input, shape index: {}]   ;;  %s3613_s11 = inlined_call_operand.vmem [shape: f32[1,64], index: 11, kind: input, shape index: {}]   ;;  %s3614_s12 = inlined_call_operand.vmem [shape: bf16[3,64,256], index: 12, kind: input, shape index: {}]   ;;  %s3615_s13 = inlined_call_operand.vmem [shape: f32[1,256], index: 13, kind: input, shape index: {}]   ;;  %s3616_s14 = inlined_call_operand.vmem [shape: f32[1,256], index: 14, kind: input, shape index: {}]   ;;  %s3617_s15 = inlined_call_operand.vmem [shape: f32[2,32,256], index: 15, kind: output, shape index: {}]  }
   0x1 LB: > { %s2399_s19 = sadd.s32 4294967295, %s3079_s18   ;;  %p2403_p0 = scmp.ge.s32.totalorder %s3079_s18, 1  ;;  %s3079_s18 = sphi %s3163_s18, %s25_s18  }
   0x2   : > { %p437_p1 = scmp.lt.s32.totalorder %s3079_s18, 3 }
   0x4   : > { %p438_p2 = pnand %p2403_p0, %p437_p1 }
   0x5   : > { %p485_p3 = scmp.lt.s32.totalorder (!%p438_p2), %s2399_s19, 1  ;;  %v2931_v0 = vld [vmem:[%s3603_s1] sm:$0xff] (!%p438_p2)   ;;  %vm525_vm0 = vcmask (!%p438_p2), 130048   ;;  %v2934_v2 = vld [vmem:[%s3604_s2 + $0x8] sm:$0xff] (!%p438_p2)   ;;  %v2935_v3 = vld [vmem:[%s3604_s2 + $0x10] sm:$0xff] (!%p438_p2)   ;;  %vm501_vm1 = vcmask (!%p438_p2), 523264  }
   0x6   : > { %441 = sbr.rel (%p438_p2) target bundleno = 1662 (0x67e), region = 80  ;;  %2709 = vmatprep.mubr.msk.bf16.mxu0 (!%p438_p2), %vm525_vm0, %v2931_v0  ;;  %v2933_v1 = vld [vmem:[%s3604_s2] sm:$0xff] (!%p438_p2)   ;;  %v2932_v7 = vld [vmem:[%s3603_s1 + $0x8] sm:$0xff] (!%p438_p2)   ;;  %v2936_v8 = vld [vmem:[%s3604_s2 + $0x18] sm:$0xff] (!%p438_p2)   ;;  %v3081_v11 = vmov (!%p438_p2), 0.0   ;;  %vm506_vm2 = vcmask (!%p438_p2), 517120  }
   0x7   : > { %2713 = vmatprep.subr.bf16.mxu1 (!%p438_p2), %v2933_v1  ;;  %v2937_v9 = vld [vmem:[%s3605_s3 + $0x40] sm:$0xff] (!%p438_p2)   ;;  %v2938_v10 = vld [vmem:[%s3605_s3 + $0x48] sm:$0xff] (!%p438_p2)   ;;  %498 = vst [vmem:[#allocation2 + $0x10] sm:$0xff] (!%p438_p2), %v3081_v11  ;;  %499 = vst [vmem:[#allocation2 + $0x18] sm:$0xff] (!%p438_p2), %v3081_v11 }
   0x8   : > { %2714 = vmatpush3.bf16.msra.mxu1 (!%p438_p2), %v2933_v1  ;;  %496 = vst [vmem:[#allocation2] sm:$0xff] (!%p438_p2), %v3081_v11  ;;  %497 = vst [vmem:[#allocation2 + $0x8] sm:$0xff] (!%p438_p2), %v3081_v11  ;;  %v2939_v12 = vld [vmem:[%s3605_s3 + $0x50] sm:$0xff] (!%p438_p2)   ;;  %v2940_v13 = vld [vmem:[%s3605_s3 + $0x58] sm:$0xff] (!%p438_p2)  }
   0x9   : > { %2715 = vmatprep.subr.bf16.mxu1 (!%p438_p2), %v2934_v2  ;;  %500 = vst [vmem:[#allocation2 + $0x20] sm:$0x3] (!%p438_p2), %v3081_v11  ;;  %502 = vst.msk [vmem:[#allocation3] sm:$0xff] (!%p438_p2), %vm501_vm1, %v3081_v11  ;;  %v2941_v14 = vld [vmem:[%s3605_s3 + $0x60] sm:$0xff] (!%p438_p2)   ;;  %v2942_v21 = vld [vmem:[%s3605_s3 + $0x68] sm:$0xff] (!%p438_p2)  }
   0xa   : > { %503 = vst.msk [vmem:[#allocation3 + $0x8] sm:$0xff] (!%p438_p2), %vm501_vm1, %v3081_v11  ;;  %504 = vst.msk [vmem:[#allocation3 + $0x10] sm:$0xff] (!%p438_p2), %vm501_vm1, %v3081_v11  ;;  %v2943_v22 = vld [vmem:[%s3605_s3 + $0x70] sm:$0xff] (!%p438_p2)   ;;  %v2944_v23 = vld [vmem:[%s3605_s3 + $0x78] sm:$0xff] (!%p438_p2)  }
   0xb   : > { %505 = vst.msk [vmem:[#allocation3 + $0x18] sm:$0xff] (!%p438_p2), %vm501_vm1, %v3081_v11  ;;  %v2945_v24 = vld [vmem:[%s3605_s3] sm:$0xff] (!%p438_p2)   ;;  %v2946_v31 = vld [vmem:[%s3605_s3 + $0x8] sm:$0xff] (!%p438_p2)   ;;  %v2947_v32 = vld [vmem:[%s3605_s3 + $0x10] sm:$0xff] (!%p438_p2)  }
   0xc   : > { %2716 = vmatpush3.bf16.msra.mxu1 (!%p438_p2), %v2934_v2  ;;  %v2948_v36 = vld [vmem:[%s3605_s3 + $0x18] sm:$0xff] (!%p438_p2)   ;;  %v2949_v37 = vld [vmem:[%s3605_s3 + $0x20] sm:$0xff] (!%p438_p2)   ;;  %v2950_v38 = vld [vmem:[%s3605_s3 + $0x28] sm:$0xff] (!%p438_p2)   ;;  %507 = vst.msk [vmem:[#allocation3 + $0x20] sm:$0x3] (!%p438_p2), %vm506_vm2, %v3081_v11 }
   0xd   : > { %s3619_s19 = smov (!%p485_p3, %s2399_s19), 1  ;;  %2717 = vmatprep.subr.bf16.mxu1 %v2935_v3  ;;  %v2951_v39 = vld [vmem:[%s3605_s3 + $0x30] sm:$0xff]   ;;  %v2952_v40 = vld [vmem:[%s3605_s3 + $0x38] sm:$0xff]   ;;  %v2953_v41 = vld [vmem:[%s3605_s3 + $0x80] sm:$0xff]  }
   0xe   : > { %s2618_s26 = sshll.u32 %s3619_s19, 4  ;;  %v2954_v47 = vld [vmem:[%s3605_s3 + $0x88] sm:$0xff]   ;;  %v2955_v49 = vld [vmem:[%s3605_s3 + $0x90] sm:$0xff]   ;;  %v2956_v50 = vld [vmem:[%s3605_s3 + $0x98] sm:$0xff]   ;;  %s2619_s25 = sshll.u32 %s3619_s19, 6 }
   0xf   : > { %s489_s29 = scalar_lea.vmem %s3602_s0, %s2618_s26  ;;  %v2957_v51 = vld [vmem:[%s3605_s3 + $0xa0] sm:$0xff]   ;;  %v2958_v52 = vld [vmem:[%s3605_s3 + $0xa8] sm:$0xff]   ;;  %v2959_v53 = vld [vmem:[%s3605_s3 + $0xb0] sm:$0xff]   ;;  %s3584_s28 = scalar_lea.vmem %s3617_s15, %s2619_s25 }
  0x10   : > { %v512_v4 = vld [vmem:[%s489_s29] sm:$0xff]  ;;  %v513_v5 = vld [vmem:[%s489_s29 + $0x8] sm:$0xff]  ;;  %2718 = vmatpush3.bf16.msra.mxu1 %v2935_v3  ;;  %v2960_v54 = vld [vmem:[%s3605_s3 + $0xb8] sm:$0xff]  }
  0x11   : > { %v514_v6 = vpack.c.bf16 %v513_v5, %v512_v4  ;;  %2719 = vmatprep.subr.bf16.mxu1 %v2936_v8  ;;  %v2961_v58 = vld [vmem:[%s3608_s6 + $0x20] sm:$0xff]   ;;  %v2962_v59 = vld [vmem:[%s3608_s6 + $0x28] sm:$0xff]   ;;  %v2963_v60 = vld [vmem:[%s3608_s6 + $0x30] sm:$0xff]  }
  0x12   : > { %v2964_v61 = vld [vmem:[%s3608_s6 + $0x38] sm:$0xff]   ;;  %v3316_v62 = vld [vmem:[%s3608_s6] sm:$0xff]  }
  0x13   : > { %2707 = vmatprep.subr.bf16.mxu0 %v514_v6  ;;  %v2474_v63 = vld [vmem:[%s3606_s4] ss:$0 sm:$0xff] }
  0x14   : > { %2708 = vmatpush3.bf16.msra.mxu0 %v514_v6  ;;  %2720 = vmatpush3.bf16.msra.mxu1 %v2936_v8  ;;  %v2475_v1 = vld [vmem:[%s3607_s5] ss:$0 sm:$0xff] }
  0x15   : > { %2725 = vmatprep.subr.bf16.mxu0 %v2937_v9  ;;  %2785 = vmatprep.subr.bf16.mxu1 %v2961_v58 }
  0x17   : > { %2710 = vmatmul.mubr.msk.bf16.vlgmr.msra.gmra.mrb[0].mxu0 %vm525_vm0, %v2932_v7 }
  0x18   : > { %2726 = vmatpush3.bf16.msra.mxu0 %v2937_v9 }
  0x19   : > { %2727 = vmatprep.subr.bf16.mxu0 %v2938_v10 }
  0x1c   : > { %2728 = vmatpush3.bf16.msra.mxu0 %v2938_v10 }
  0x1d   : > { %2729 = vmatprep.subr.bf16.mxu0 %v2939_v12 }
  0x20   : > { %2730 = vmatpush3.bf16.msra.mxu0 %v2939_v12 }
  0x21   : > { %2731 = vmatprep.subr.bf16.mxu0 %v2940_v13 }
  0x24   : > { %2732 = vmatpush3.bf16.msra.mxu0 %v2940_v13 }
  0x25   : > { %2733 = vmatprep.subr.bf16.mxu0 %v2941_v14 }
  0x28   : > { %2734 = vmatpush3.bf16.msra.mxu0 %v2941_v14 }
  0x29   : > { %2735 = vmatprep.subr.bf16.mxu0 %v2942_v21 }
  0x2c   : > { %2736 = vmatpush3.bf16.msra.mxu0 %v2942_v21 }
  0x2d   : > { %2737 = vmatprep.subr.bf16.mxu0 %v2943_v22 }
  0x30   : > { %2738 = vmatpush3.bf16.msra.mxu0 %v2943_v22 }
  0x31   : > { %2739 = vmatprep.subr.bf16.mxu0 %v2944_v23 }
  0x34   : > { %2740 = vmatpush3.bf16.msra.mxu0 %v2944_v23 }
  0x35   : > { %2745 = vmatprep.subr.bf16.mxu0 %v2945_v24 }
  0xea   : > { %v2711_v15 = vpop.f32.mrb[0].mxu0 }
  0xeb   : > { %v566_v16 = vpop.f32.mrb[1].mxu0 }
  0xec   : > { %v2712_v17 = vpop.f32.mrb[2].mxu0 }
  0xed   : > { %v582_v18 = vpack.c.bf16 %v2712_v17, %v2711_v15  ;;  %v569_v19 = vpop.f32.mrb[3].mxu0 }
  0xee   : > { %v581_v20 = vpack.c.bf16 %v569_v19, %v566_v16 }
  0xf0   : > { %2721 = vmatprep.mubr.msk.bf16.mxu1 %vm501_vm1, %v581_v20 }
  0xf1   : > { %2722 = vmatmul.mubr.msk.bf16.vlgmr.msra.gmra.mrb[0].mxu1 %vm501_vm1, %v582_v18 }
  0xf2   : > { %2786 = vmatpush3.bf16.msra.mxu1 %v2961_v58 }
  0xf3   : > { %2787 = vmatprep.subr.bf16.mxu1 %v2962_v59 }
  0xf6   : > { %2788 = vmatpush3.bf16.msra.mxu1 %v2962_v59 }
  0xf7   : > { %2789 = vmatprep.subr.bf16.mxu1 %v2963_v60 }
  0xfa   : > { %2790 = vmatpush3.bf16.msra.mxu1 %v2963_v60 }
  0xfb   : > { %2791 = vmatprep.subr.bf16.mxu1 %v2964_v61 }
  0xfe   : > { %2792 = vmatpush3.bf16.msra.mxu1 %v2964_v61  ;;  %v2966_v61 = vld [vmem:[%s3608_s6 + $0x8] sm:$0xff]  }
  0xff   : > { %2797 = vmatprep.subr.bf16.mxu1 %v3316_v62 }
 0x1c4   : > { %v3239_v25 = vpop.f32.mrb[0].mxu1 }
 0x1c5   : > { %672 = vst [vmem:[#allocation2 + $0x11] sm:$0xff] %v3239_v25  ;;  %v3242_v26 = vpop.f32.mrb[1].mxu1 }
 0x1c6   : > { %670 = vst [vmem:[#allocation2 + $0x1] sm:$0xff] %v3242_v26  ;;  %v3245_v27 = vpop.f32.mrb[2].mxu1 }
 0x1c7   : > { %673 = vst [vmem:[#allocation2 + $0x19] sm:$0xff] %v3245_v27  ;;  %v3248_v28 = vpop.f32.mrb[3].mxu1  ;;  %v701_v29 = vpack.c.bf16 %v3245_v27, %v3239_v25 }
 0x1c8   : > { %671 = vst [vmem:[#allocation2 + $0x9] sm:$0xff] %v3248_v28  ;;  %v700_v30 = vpack.c.bf16 %v3248_v28, %v3242_v26 }
 0x1ca   : > { %2741 = vmatprep.mubr.bf16.mxu0 %v700_v30 }
 0x1cb   : > { %2742 = vmatmul.mubr.bf16.vlgmr.msra.gmra.mrb[4].mxu0 %v701_v29 }
 0x1cc   : > { %2746 = vmatpush3.bf16.msra.mxu0 %v2945_v24 }
 0x1cd   : > { %2747 = vmatprep.subr.bf16.mxu0 %v2946_v31  ;;  %v674_v33 = vld [vmem:[#allocation2] sm:$0xff] }
 0x1ce   : > { %v677_v43 = vld [vmem:[#allocation2 + $0x18] sm:$0xff] }
 0x1cf   : > { %v675_v34 = vld [vmem:[#allocation2 + $0x8] sm:$0xff]  ;;  %v676_v42 = vld [vmem:[#allocation2 + $0x10] sm:$0xff]  ;;  %v916_v56 = vld [vmem:[#allocation2 + $0x1a] sm:$0xff] }
 0x1d0   : > { %v678_v35 = vpack.c.bf16 %v675_v34, %v674_v33  ;;  %2748 = vmatpush3.bf16.msra.mxu0 %v2946_v31  ;;  %v913_v44 = vld [vmem:[#allocation2 + $0x2] sm:$0xff]  ;;  %v914_v45 = vld [vmem:[#allocation2 + $0xa] sm:$0xff]  ;;  %v679_v46 = vpack.c.bf16 %v677_v43, %v676_v42  ;;  %v915_v55 = vld [vmem:[#allocation2 + $0x12] sm:$0xff] }
 0x1d1   : > { %2749 = vmatprep.subr.bf16.mxu0 %v2947_v32  ;;  %v917_v48 = vpack.c.bf16 %v914_v45, %v913_v44  ;;  %v918_v57 = vpack.c.bf16 %v916_v56, %v915_v55 }
 0x1d2   : > { %2761 = vmatprep.mubr.bf16.mxu0 %v678_v35 }
 0x1d4   : > { %2750 = vmatpush3.bf16.msra.mxu0 %v2947_v32 }
 0x1d5   : > { %2751 = vmatprep.subr.bf16.mxu0 %v2948_v36 }
 0x1d8   : > { %2752 = vmatpush3.bf16.msra.mxu0 %v2948_v36 }
 0x1d9   : > { %2753 = vmatprep.subr.bf16.mxu0 %v2949_v37 }
 0x1dc   : > { %2754 = vmatpush3.bf16.msra.mxu0 %v2949_v37 }
 0x1dd   : > { %2755 = vmatprep.subr.bf16.mxu0 %v2950_v38 }
 0x1e0   : > { %2756 = vmatpush3.bf16.msra.mxu0 %v2950_v38 }
 0x1e1   : > { %2757 = vmatprep.subr.bf16.mxu0 %v2951_v39 }
 0x1e4   : > { %2758 = vmatpush3.bf16.msra.mxu0 %v2951_v39 }
 0x1e5   : > { %2759 = vmatprep.subr.bf16.mxu0 %v2952_v40 }
 0x1e8   : > { %2760 = vmatpush3.bf16.msra.mxu0 %v2952_v40 }
 0x1e9   : > { %2765 = vmatprep.subr.bf16.mxu0 %v2953_v41 }
 0x1eb   : > { %2762 = vmatmul.mubr.bf16.vlgmr.msra.gmra.mrb[4].mxu0 %v679_v46 }
 0x1ec   : > { %2766 = vmatpush3.bf16.msra.mxu0 %v2953_v41  ;;  %2781 = vmatprep.mubr.bf16.mxu0 %v917_v48 }
 0x1ed   : > { %2767 = vmatprep.subr.bf16.mxu0 %v2954_v47 }
 0x1f0   : > { %2768 = vmatpush3.bf16.msra.mxu0 %v2954_v47 }
 0x1f1   : > { %2769 = vmatprep.subr.bf16.mxu0 %v2955_v49 }
 0x1f4   : > { %2770 = vmatpush3.bf16.msra.mxu0 %v2955_v49 }
 0x1f5   : > { %2771 = vmatprep.subr.bf16.mxu0 %v2956_v50 }
 0x1f8   : > { %2772 = vmatpush3.bf16.msra.mxu0 %v2956_v50 }
 0x1f9   : > { %2773 = vmatprep.subr.bf16.mxu0 %v2957_v51 }
 0x1fc   : > { %2774 = vmatpush3.bf16.msra.mxu0 %v2957_v51 }
 0x1fd   : > { %2775 = vmatprep.subr.bf16.mxu0 %v2958_v52 }
 0x200   : > { %2776 = vmatpush3.bf16.msra.mxu0 %v2958_v52 }
 0x201   : > { %2777 = vmatprep.subr.bf16.mxu0 %v2959_v53 }
 0x204   : > { %2778 = vmatpush3.bf16.msra.mxu0 %v2959_v53 }
 0x205   : > { %2779 = vmatprep.subr.bf16.mxu0 %v2960_v54 }
 0x208   : > { %2780 = vmatpush3.bf16.msra.mxu0 %v2960_v54 }
 0x20b   : > { %2782 = vmatmul.mubr.bf16.vlgmr.msra.gmra.mrb[4].mxu0 %v918_v57 }
 0x2de   : > { %v2783_v0 = vpop.f32.mrb[4].mxu0 }
 0x2df   : > { %v1046_v2 = vmul.f32 %v2783_v0, %v2474_v63  ;;  %v1018_v3 = vpop.f32.mrb[5].mxu0  ;;  %v2967_v0 = vld [vmem:[%s3608_s6 + $0x10] sm:$0xff]  }
 0x2e0   : > { %v1044_v4 = vmul.f32 %v2474_v63, %v1018_v3  ;;  %v2784_v5 = vpop.f32.mrb[6].mxu0 }
 0x2e1   : > { %v1057_v6 = vadd.f32 %v2475_v1, %v1046_v2  ;;  %v1047_v7 = vmul.f32 %v2784_v5, %v2474_v63  ;;  %v1021_v8 = vpop.f32.mrb[7].mxu0  ;;  %v2969_v2 = vld [vmem:[%s3608_s6 + $0x40] sm:$0xff]  }
 0x2e2   : > { %v1055_v9 = vadd.f32 %v2475_v1, %v1044_v4  ;;  %v1045_v10 = vmul.f32 %v2474_v63, %v1021_v8 }
 0x2e3   : > { %v1065_v11 = vmul.f32 0.044715, %v1057_v6  ;;  %v1058_v12 = vadd.f32 %v2475_v1, %v1047_v7  ;;  %v1061_v39 = vmul.f32 0.5, %v1057_v6  ;;  %v2970_v7 = vld [vmem:[%s3608_s6 + $0x48] sm:$0xff]  }
 0x2e4   : > { %v1063_v13 = vmul.f32 0.044715, %v1055_v9  ;;  %v1056_v14 = vadd.f32 %v2475_v1, %v1045_v10  ;;  %v1059_v42 = vmul.f32 0.5, %v1055_v9  ;;  %v2968_v1 = vld [vmem:[%s3608_s6 + $0x18] sm:$0xff]  }
 0x2e5   : > { %v1069_v15 = vmul.f32 %v1065_v11, %v1057_v6  ;;  %v1066_v16 = vmul.f32 0.044715, %v1058_v12  ;;  %v1062_v46 = vmul.f32 0.5, %v1058_v12  ;;  %v2972_v10 = vld [vmem:[%s3608_s6 + $0x58] sm:$0xff]  }
 0x2e6   : > { %v1067_v17 = vmul.f32 %v1063_v13, %v1055_v9  ;;  %v1064_v18 = vmul.f32 0.044715, %v1056_v14  ;;  %v1060_v49 = vmul.f32 0.5, %v1056_v14 }
 0x2e7   : > { %v1073_v19 = vmul.f32 %v1069_v15, %v1057_v6  ;;  %v1070_v20 = vmul.f32 %v1066_v16, %v1058_v12  ;;  %v2974_v15 = vld [vmem:[%s3611_s9 + $0x48] sm:$0xff]   ;;  %v2975_v16 = vld [vmem:[%s3611_s9 + $0x50] sm:$0xff]  }
 0x2e8   : > { %v1071_v21 = vmul.f32 %v1067_v17, %v1055_v9  ;;  %v1068_v22 = vmul.f32 %v1064_v18, %v1056_v14  ;;  %v2976_v17 = vld [vmem:[%s3611_s9 + $0x58] sm:$0xff]   ;;  %v2977_v18 = vld [vmem:[%s3611_s9 + $0x60] sm:$0xff]  }
 0x2e9   : > { %v1077_v23 = vadd.f32 %v1073_v19, %v1057_v6  ;;  %v1074_v24 = vmul.f32 %v1070_v20, %v1058_v12  ;;  %v2978_v19 = vld [vmem:[%s3611_s9 + $0x68] sm:$0xff]   ;;  %v2979_v20 = vld [vmem:[%s3611_s9 + $0x70] sm:$0xff]  }
 0x2ea   : > { %v1075_v29 = vadd.f32 %v1071_v21, %v1055_v9  ;;  %v1072_v30 = vmul.f32 %v1068_v22, %v1056_v14  ;;  %v2971_v9 = vld [vmem:[%s3608_s6 + $0x50] sm:$0xff]   ;;  %v2980_v21 = vld [vmem:[%s3611_s9 + $0x78] sm:$0xff]   ;;  %v3384_v22 = vld [vmem:[%s3611_s9] sm:$0xff]  }
 0x2eb   : > { %v1081_v31 = vmul.f32 0.7978846, %v1077_v23  ;;  %v1078_v32 = vadd.f32 %v1074_v24, %v1058_v12  ;;  %v2510_v23 = vld [vmem:[%s3609_s7] ss:$0 sm:$0xff] }
 0x2ec   : > { %v1079_v33 = vmul.f32 0.7978846, %v1075_v29  ;;  %v1076_v34 = vadd.f32 %v1072_v30, %v1056_v14  ;;  %v2973_v14 = vld [vmem:[%s3611_s9 + $0x40] sm:$0xff]  }
 0x2ed   : > { %3033 = vtanh.f32 %v1081_v31  ;;  %v1082_v35 = vmul.f32 0.7978846, %v1078_v32  ;;  %v2511_v29 = vld [vmem:[%s3610_s8] ss:$0 sm:$0xff] }
 0x2ee   : > { %3035 = vtanh.f32 %v1079_v33  ;;  %v1080_v36 = vmul.f32 0.7978846, %v1076_v34 }
 0x2ef   : > { %3037 = vtanh.f32 %v1082_v35 }
 0x2f0   : > { %3039 = vtanh.f32 %v1080_v36 }
 0x2f7   : > { %v3034_v37 = vpop.eup %3033 }
 0x2f8   : > { %v3036_v38 = vpop.eup %3035  ;;  %v1089_v40 = vadd.f32 1.0, %v3034_v37 }
 0x2f9   : > { %v3038_v41 = vpop.eup %3037  ;;  %v1087_v43 = vadd.f32 1.0, %v3036_v38 }
 0x2fa   : > { %v3040_v44 = vpop.eup %3039  ;;  %v1093_v45 = vmul.f32 %v1089_v40, %v1061_v39  ;;  %v1090_v47 = vadd.f32 1.0, %v3038_v41 }
 0x2fb   : > { %v1091_v48 = vmul.f32 %v1087_v43, %v1059_v42  ;;  %v1088_v50 = vadd.f32 1.0, %v3040_v44 }
 0x2fc   : > { %1097 = vst.msk [vmem:[#allocation3 + $0x11] sm:$0xff] %vm501_vm1, %v1093_v45  ;;  %v1094_v51 = vmul.f32 %v1090_v47, %v1062_v46 }
 0x2fd   : > { %1095 = vst.msk [vmem:[#allocation3 + $0x1] sm:$0xff] %vm501_vm1, %v1091_v48  ;;  %v1092_v52 = vmul.f32 %v1088_v50, %v1060_v49 }
 0x2fe   : > { %1098 = vst.msk [vmem:[#allocation3 + $0x19] sm:$0xff] %vm501_vm1, %v1094_v51 }
 0x2ff   : > { %1096 = vst.msk [vmem:[#allocation3 + $0x9] sm:$0xff] %vm501_vm1, %v1092_v52 }
 0x303   : > { %v1115_v58 = vld [vmem:[#allocation3 + $0x11] sm:$0xff] }
 0x304   : > { %v1113_v54 = vld [vmem:[#allocation3 + $0x1] sm:$0xff] }
 0x305   : > { %v1116_v53 = vld [vmem:[#allocation3 + $0x19] sm:$0xff] }
 0x306   : > { %v1114_v55 = vld [vmem:[#allocation3 + $0x9] sm:$0xff]  ;;  %v1118_v59 = vpack.c.bf16 %v1116_v53, %v1115_v58  ;;  %v1099_v60 = vld [vmem:[#allocation3] sm:$0xff]  ;;  %v1102_v3 = vld [vmem:[#allocation3 + $0x18] sm:$0xff] }
 0x307   : > { %v1100_v56 = vld [vmem:[#allocation3 + $0x8] sm:$0xff]  ;;  %v1117_v57 = vpack.c.bf16 %v1114_v55, %v1113_v54  ;;  %v1288_v11 = vld [vmem:[#allocation3 + $0x12] sm:$0xff]  ;;  %v1289_v12 = vld [vmem:[#allocation3 + $0x1a] sm:$0xff] }
 0x308   : > { %v1103_v63 = vpack.c.bf16 %v1100_v56, %v1099_v60  ;;  %v1286_v4 = vld [vmem:[#allocation3 + $0x2] sm:$0xff]  ;;  %v1287_v5 = vld [vmem:[#allocation3 + $0xa] sm:$0xff]  ;;  %v1291_v13 = vpack.c.bf16 %v1289_v12, %v1288_v11 }
 0x309   : > { %2793 = vmatprep.mubr.msk.bf16.mxu1 %vm501_vm1, %v1117_v57  ;;  %v1290_v8 = vpack.c.bf16 %v1287_v5, %v1286_v4 }
 0x30a   : > { %2794 = vmatmul.mubr.msk.bf16.vlgmr.msra.gmra.mrb[4].mxu1 %vm501_vm1, %v1118_v59 }
 0x30b   : > { %2798 = vmatpush3.bf16.msra.mxu1 %v3316_v62  ;;  %2805 = vmatprep.mubr.msk.bf16.mxu1 %vm501_vm1, %v1103_v63  ;;  %v1101_v62 = vld [vmem:[#allocation3 + $0x10] sm:$0xff] }
 0x30c   : > { %2799 = vmatprep.subr.bf16.mxu1 %v2966_v61  ;;  %v1104_v6 = vpack.c.bf16 %v1102_v3, %v1101_v62 }
 0x30f   : > { %2800 = vmatpush3.bf16.msra.mxu1 %v2966_v61 }
 0x310   : > { %2801 = vmatprep.subr.bf16.mxu1 %v2967_v0 }
 0x313   : > { %2802 = vmatpush3.bf16.msra.mxu1 %v2967_v0 }
 0x314   : > { %2803 = vmatprep.subr.bf16.mxu1 %v2968_v1 }
 0x317   : > { %2804 = vmatpush3.bf16.msra.mxu1 %v2968_v1 }
 0x318   : > { %2809 = vmatprep.subr.bf16.mxu1 %v2969_v2 }
 0x31a   : > { %2806 = vmatmul.mubr.msk.bf16.vlgmr.msra.gmra.mrb[4].mxu1 %vm501_vm1, %v1104_v6 }
 0x31b   : > { %2810 = vmatpush3.bf16.msra.mxu1 %v2969_v2  ;;  %2817 = vmatprep.mubr.msk.bf16.mxu1 %vm501_vm1, %v1290_v8 }
 0x31c   : > { %2811 = vmatprep.subr.bf16.mxu1 %v2970_v7 }
 0x31f   : > { %2812 = vmatpush3.bf16.msra.mxu1 %v2970_v7 }
 0x320   : > { %2813 = vmatprep.subr.bf16.mxu1 %v2971_v9 }
 0x323   : > { %2814 = vmatpush3.bf16.msra.mxu1 %v2971_v9 }
 0x324   : > { %2815 = vmatprep.subr.bf16.mxu1 %v2972_v10 }
 0x327   : > { %2816 = vmatpush3.bf16.msra.mxu1 %v2972_v10 }
 0x328   : > { %2821 = vmatprep.subr.bf16.mxu1 %v2973_v14 }
 0x32a   : > { %2818 = vmatmul.mubr.msk.bf16.vlgmr.msra.gmra.mrb[4].mxu1 %vm501_vm1, %v1291_v13 }
 0x32b   : > { %2822 = vmatpush3.bf16.msra.mxu1 %v2973_v14 }
 0x32c   : > { %2823 = vmatprep.subr.bf16.mxu1 %v2974_v15 }
 0x32f   : > { %2824 = vmatpush3.bf16.msra.mxu1 %v2974_v15  ;;  %v2982_v15 = vld [vmem:[%s3611_s9 + $0x8] sm:$0xff]  }
 0x330   : > { %2825 = vmatprep.subr.bf16.mxu1 %v2975_v16 }
 0x333   : > { %2826 = vmatpush3.bf16.msra.mxu1 %v2975_v16  ;;  %v2983_v16 = vld [vmem:[%s3611_s9 + $0x10] sm:$0xff]  }
 0x334   : > { %2827 = vmatprep.subr.bf16.mxu1 %v2976_v17 }
 0x337   : > { %2828 = vmatpush3.bf16.msra.mxu1 %v2976_v17 }
 0x338   : > { %2829 = vmatprep.subr.bf16.mxu1 %v2977_v18 }
 0x33b   : > { %2830 = vmatpush3.bf16.msra.mxu1 %v2977_v18 }
 0x33c   : > { %2831 = vmatprep.subr.bf16.mxu1 %v2978_v19 }
 0x33f   : > { %2832 = vmatpush3.bf16.msra.mxu1 %v2978_v19 }
 0x340   : > { %2833 = vmatprep.subr.bf16.mxu1 %v2979_v20 }
 0x343   : > { %2834 = vmatpush3.bf16.msra.mxu1 %v2979_v20  ;;  %v2984_v20 = vld [vmem:[%s3611_s9 + $0x18] sm:$0xff]  }
 0x344   : > { %2835 = vmatprep.subr.bf16.mxu1 %v2980_v21 }
 0x347   : > { %2836 = vmatpush3.bf16.msra.mxu1 %v2980_v21  ;;  %v2985_v21 = vld [vmem:[%s3611_s9 + $0x20] sm:$0xff]  }
 0x348   : > { %2841 = vmatprep.subr.bf16.mxu1 %v3384_v22 }
 0x3fd   : > { %v2819_v24 = vpop.f32.mrb[4].mxu1 }
 0x3fe   : > { %v1393_v30 = vmul.f32 %v2819_v24, %v2510_v23  ;;  %v1365_v31 = vpop.f32.mrb[5].mxu1  ;;  %v2988_v24 = vld [vmem:[%s3611_s9 + $0x38] sm:$0xff]  }
 0x3ff   : > { %v1391_v32 = vmul.f32 %v2510_v23, %v1365_v31  ;;  %v2820_v33 = vpop.f32.mrb[6].mxu1 }
 0x400   : > { %v1404_v34 = vadd.f32 %v2511_v29, %v1393_v30  ;;  %v1394_v35 = vmul.f32 %v2820_v33, %v2510_v23  ;;  %v1368_v36 = vpop.f32.mrb[7].mxu1 }
 0x401   : > { %v1402_v37 = vadd.f32 %v2511_v29, %v1391_v32  ;;  %v1392_v38 = vmul.f32 %v2510_v23, %v1368_v36  ;;  %v2987_v23 = vld [vmem:[%s3611_s9 + $0x30] sm:$0xff]  }
 0x402   : > { %v1408_v39 = vadd.f32 %v3239_v25, %v1404_v34  ;;  %v1405_v40 = vadd.f32 %v2511_v29, %v1394_v35  ;;  %v2990_v35 = vld [vmem:[%s3611_s9 + $0x88] sm:$0xff]  }
 0x403   : > { %v1406_v41 = vadd.f32 %v1402_v37, %v3242_v26  ;;  %v1403_v42 = vadd.f32 %v2511_v29, %v1392_v38  ;;  %v2989_v29 = vld [vmem:[%s3611_s9 + $0x80] sm:$0xff]   ;;  %v2991_v37 = vld [vmem:[%s3611_s9 + $0x90] sm:$0xff]   ;;  %v2992_v38 = vld [vmem:[%s3611_s9 + $0x98] sm:$0xff]  }
 0x404   : > { %v1416_v43 = vmul.f32 0.044715, %v1408_v39  ;;  %v1409_v44 = vadd.f32 %v3245_v27, %v1405_v40  ;;  %v1412_v0 = vmul.f32 0.5, %v1408_v39  ;;  %v2994_v40 = vld [vmem:[%s3611_s9 + $0xa8] sm:$0xff]  }
 0x405   : > { %v1414_v45 = vmul.f32 0.044715, %v1406_v41  ;;  %v1407_v46 = vadd.f32 %v1403_v42, %v3248_v28  ;;  %v1410_v62 = vmul.f32 0.5, %v1406_v41  ;;  %v2996_v42 = vld [vmem:[%s3611_s9 + $0xb8] sm:$0xff]  }
 0x406   : > { %v1420_v47 = vmul.f32 %v1416_v43, %v1408_v39  ;;  %v1417_v48 = vmul.f32 0.044715, %v1409_v44  ;;  %v1413_v6 = vmul.f32 0.5, %v1409_v44 }
 0x407   : > { %v1418_v49 = vmul.f32 %v1414_v45, %v1406_v41  ;;  %v1415_v50 = vmul.f32 0.044715, %v1407_v46  ;;  %v1411_v9 = vmul.f32 0.5, %v1407_v46 }
 0x408   : > { %v1424_v51 = vmul.f32 %v1420_v47, %v1408_v39  ;;  %v1421_v52 = vmul.f32 %v1417_v48, %v1409_v44  ;;  %v2997_v47 = vld [vmem:[%s3614_s12 + $0x40] ss:$8 sps:$4 sm:$0xff]   ;;  %v3002_v48 = vld [vmem:[%s3614_s12 + $0x54] ss:$8 sps:$4 sm:$0xff]  }
 0x409   : > { %v1422_v53 = vmul.f32 %v1418_v49, %v1406_v41  ;;  %v1419_v54 = vmul.f32 %v1415_v50, %v1407_v46  ;;  %v3000_v49 = vld [vmem:[%s3614_s12 + $0x50] ss:$8 sps:$4 sm:$0xff]   ;;  %v3003_v50 = vld [vmem:[%s3614_s12 + $0x60] ss:$8 sps:$4 sm:$0xff]  }
 0x40a   : > { %v1428_v55 = vadd.f32 %v1424_v51, %v1408_v39  ;;  %v1425_v25 = vmul.f32 %v1421_v52, %v1409_v44  ;;  %v2993_v39 = vld [vmem:[%s3611_s9 + $0xa0] sm:$0xff]   ;;  %v3008_v52 = vld [vmem:[%s3614_s12 + $0x74] ss:$8 sps:$4 sm:$0xff]  }
 0x40b   : > { %v1426_v56 = vadd.f32 %v1422_v53, %v1406_v41  ;;  %v1423_v57 = vmul.f32 %v1419_v54, %v1407_v46  ;;  %v2995_v41 = vld [vmem:[%s3611_s9 + $0xb0] sm:$0xff]   ;;  %v3005_v51 = vld [vmem:[%s3614_s12 + $0x64] ss:$8 sps:$4 sm:$0xff]   ;;  %v3082_v53 = vmov 0  }
 0x40c   : > { %v1432_v26 = vmul.f32 0.7978846, %v1428_v55  ;;  %v1429_v58 = vadd.f32 %v1425_v25, %v1409_v44  ;;  %1982 = vmatprep.mubr.bf16.mxu0 %v3082_v53  ;;  %v3006_v54 = vld [vmem:[%s3614_s12 + $0x70] ss:$8 sps:$4 sm:$0xff]   ;;  %v3011_v55 = vld [vmem:[%s3614_s12 + $0x4] ss:$8 sps:$4 sm:$0xff]  }
 0x40d   : > { %v1430_v59 = vmul.f32 0.7978846, %v1426_v56  ;;  %v1427_v60 = vadd.f32 %v1423_v57, %v1407_v46  ;;  %v2999_v46 = vld [vmem:[%s3614_s12 + $0x44] ss:$8 sps:$4 sm:$0xff]   ;;  %v2568_v25 = vld [vmem:[%s3612_s10] ss:$0 sm:$0xff] }
 0x40e   : > { %3041 = vtanh.f32 %v1432_v26  ;;  %v1433_v27 = vmul.f32 0.7978846, %v1429_v58  ;;  %1950 = vmatprep.subr.bf16.mxu0 %v2999_v46  ;;  %v2569_v57 = vld [vmem:[%s3613_s11] ss:$0 sm:$0xff]  ;;  %v3014_v46 = vld [vmem:[%s3614_s12 + $0x14] ss:$8 sps:$4 sm:$0xff]  }
 0x40f   : > { %3043 = vtanh.f32 %v1430_v59  ;;  %v1431_v28 = vmul.f32 0.7978846, %v1427_v60  ;;  %1951 = vmatpush1.bf16.msra.mxu0 %v2997_v47  ;;  %v3012_v47 = vld [vmem:[%s3614_s12 + $0x10] ss:$8 sps:$4 sm:$0xff]  }
 0x410   : > { %3045 = vtanh.f32 %v1433_v27  ;;  %1952 = vmatprep.subr.bf16.mxu0 %v3002_v48  ;;  %v3017_v48 = vld [vmem:[%s3614_s12 + $0x24] ss:$8 sps:$4 sm:$0xff]  }
 0x411   : > { %3047 = vtanh.f32 %v1431_v28 }
 0x413   : > { %1953 = vmatpush1.bf16.msra.mxu0 %v3000_v49 }
 0x414   : > { %1954 = vmatprep.subr.bf16.mxu0 %v3005_v51 }
 0x417   : > { %1955 = vmatpush1.bf16.msra.mxu0 %v3003_v50  ;;  %v3015_v50 = vld [vmem:[%s3614_s12 + $0x20] ss:$8 sps:$4 sm:$0xff]  }
 0x418   : > { %v3042_v61 = vpop.eup %3041  ;;  %1956 = vmatprep.subr.bf16.mxu0 %v3008_v52 }
 0x419   : > { %v3044_v63 = vpop.eup %3043  ;;  %v1440_v1 = vadd.f32 1.0, %v3042_v61 }
 0x41a   : > { %v3046_v2 = vpop.eup %3045  ;;  %v1438_v3 = vadd.f32 1.0, %v3044_v63 }
 0x41b   : > { %v3048_v4 = vpop.eup %3047  ;;  %v1444_v5 = vmul.f32 %v1440_v1, %v1412_v0  ;;  %v1441_v7 = vadd.f32 1.0, %v3046_v2  ;;  %1957 = vmatpush1.bf16.msra.mxu0 %v3006_v54  ;;  %v3020_v54 = vld [vmem:[%s3614_s12 + $0x34] ss:$8 sps:$4 sm:$0xff]  }
 0x41c   : > { %v1442_v8 = vmul.f32 %v1438_v3, %v1410_v62  ;;  %v1439_v10 = vadd.f32 1.0, %v3048_v4  ;;  %2049 = vmatprep.subr.bf16.mxu0 %v3011_v55  ;;  %v3018_v55 = vld [vmem:[%s3614_s12 + $0x30] ss:$8 sps:$4 sm:$0xff]  }
 0x41d   : > { %1448 = vst [vmem:[#allocation2 + $0x11] sm:$0xff] %v1444_v5  ;;  %v1445_v11 = vmul.f32 %v1441_v7, %v1413_v6 }
 0x41e   : > { %1446 = vst [vmem:[#allocation2 + $0x1] sm:$0xff] %v1442_v8  ;;  %v1443_v12 = vmul.f32 %v1439_v10, %v1411_v9 }
 0x41f   : > { %1449 = vst [vmem:[#allocation2 + $0x19] sm:$0xff] %v1445_v11  ;;  %v1477_v13 = vpack.c.bf16 %v1445_v11, %v1444_v5 }
 0x420   : > { %1447 = vst [vmem:[#allocation2 + $0x9] sm:$0xff] %v1443_v12  ;;  %v1476_v14 = vpack.c.bf16 %v1443_v12, %v1442_v8 }
 0x422   : > { %2837 = vmatprep.mubr.bf16.mxu1 %v1476_v14 }
 0x423   : > { %2838 = vmatmul.mubr.bf16.vlgmr.msra.gmra.mrb[8].mxu1 %v1477_v13 }
 0x424   : > { %2842 = vmatpush3.bf16.msra.mxu1 %v3384_v22  ;;  %v2986_v22 = vld [vmem:[%s3611_s9 + $0x28] sm:$0xff]  }
 0x425   : > { %2843 = vmatprep.subr.bf16.mxu1 %v2982_v15  ;;  %v1450_v17 = vld [vmem:[#allocation2] sm:$0xff] }
 0x426   : > { %v1453_v31 = vld [vmem:[#allocation2 + $0x18] sm:$0xff] }
 0x427   : > { %v1451_v18 = vld [vmem:[#allocation2 + $0x8] sm:$0xff]  ;;  %v1452_v30 = vld [vmem:[#allocation2 + $0x10] sm:$0xff]  ;;  %v1692_v44 = vld [vmem:[#allocation2 + $0x1a] sm:$0xff] }
 0x428   : > { %v1454_v19 = vpack.c.bf16 %v1451_v18, %v1450_v17  ;;  %2844 = vmatpush3.bf16.msra.mxu1 %v2982_v15  ;;  %v1689_v32 = vld [vmem:[#allocation2 + $0x2] sm:$0xff]  ;;  %v1690_v33 = vld [vmem:[#allocation2 + $0xa] sm:$0xff]  ;;  %v1455_v34 = vpack.c.bf16 %v1453_v31, %v1452_v30  ;;  %v1691_v43 = vld [vmem:[#allocation2 + $0x12] sm:$0xff] }
 0x429   : > { %2845 = vmatprep.subr.bf16.mxu1 %v2983_v16  ;;  %v1693_v36 = vpack.c.bf16 %v1690_v33, %v1689_v32  ;;  %v1694_v45 = vpack.c.bf16 %v1692_v44, %v1691_v43 }
 0x42a   : > { %2857 = vmatprep.mubr.bf16.mxu1 %v1454_v19 }
 0x42c   : > { %2846 = vmatpush3.bf16.msra.mxu1 %v2983_v16 }
 0x42d   : > { %2847 = vmatprep.subr.bf16.mxu1 %v2984_v20 }
 0x430   : > { %2848 = vmatpush3.bf16.msra.mxu1 %v2984_v20 }
 0x431   : > { %2849 = vmatprep.subr.bf16.mxu1 %v2985_v21 }
 0x434   : > { %2850 = vmatpush3.bf16.msra.mxu1 %v2985_v21 }
 0x435   : > { %2851 = vmatprep.subr.bf16.mxu1 %v2986_v22 }
 0x438   : > { %2852 = vmatpush3.bf16.msra.mxu1 %v2986_v22 }
 0x439   : > { %2853 = vmatprep.subr.bf16.mxu1 %v2987_v23 }
 0x43c   : > { %2854 = vmatpush3.bf16.msra.mxu1 %v2987_v23 }
 0x43d   : > { %2855 = vmatprep.subr.bf16.mxu1 %v2988_v24 }
 0x440   : > { %2856 = vmatpush3.bf16.msra.mxu1 %v2988_v24 }
 0x441   : > { %2861 = vmatprep.subr.bf16.mxu1 %v2989_v29 }
 0x443   : > { %2858 = vmatmul.mubr.bf16.vlgmr.msra.gmra.mrb[8].mxu1 %v1455_v34 }
 0x444   : > { %2862 = vmatpush3.bf16.msra.mxu1 %v2989_v29  ;;  %2877 = vmatprep.mubr.bf16.mxu1 %v1693_v36 }
 0x445   : > { %2863 = vmatprep.subr.bf16.mxu1 %v2990_v35 }
 0x448   : > { %2864 = vmatpush3.bf16.msra.mxu1 %v2990_v35 }
 0x449   : > { %2865 = vmatprep.subr.bf16.mxu1 %v2991_v37 }
 0x44c   : > { %2866 = vmatpush3.bf16.msra.mxu1 %v2991_v37 }
 0x44d   : > { %2867 = vmatprep.subr.bf16.mxu1 %v2992_v38 }
 0x450   : > { %2868 = vmatpush3.bf16.msra.mxu1 %v2992_v38 }
 0x451   : > { %2869 = vmatprep.subr.bf16.mxu1 %v2993_v39 }
 0x454   : > { %2870 = vmatpush3.bf16.msra.mxu1 %v2993_v39 }
 0x455   : > { %2871 = vmatprep.subr.bf16.mxu1 %v2994_v40 }
 0x458   : > { %2872 = vmatpush3.bf16.msra.mxu1 %v2994_v40 }
 0x459   : > { %2873 = vmatprep.subr.bf16.mxu1 %v2995_v41 }
 0x45c   : > { %2874 = vmatpush3.bf16.msra.mxu1 %v2995_v41 }
 0x45d   : > { %2875 = vmatprep.subr.bf16.mxu1 %v2996_v42 }
 0x460   : > { %2876 = vmatpush3.bf16.msra.mxu1 %v2996_v42  ;;  %v3009_v42 = vld [vmem:[%s3614_s12] ss:$8 sps:$4 sm:$0xff]  }
 0x463   : > { %2878 = vmatmul.mubr.bf16.vlgmr.msra.gmra.mrb[8].mxu1 %v1694_v45 }
 0x536   : > { %v2879_v56 = vpop.f32.mrb[8].mxu1 }
 0x537   : > { %v1822_v26 = vmul.f32 %v2879_v56, %v2568_v25  ;;  %v1794_v58 = vpop.f32.mrb[9].mxu1 }
 0x538   : > { %v1820_v59 = vmul.f32 %v2568_v25, %v1794_v58  ;;  %v2880_v60 = vpop.f32.mrb[10].mxu1 }
 0x539   : > { %v1833_v27 = vadd.f32 %v2569_v57, %v1822_v26  ;;  %v1823_v28 = vmul.f32 %v2880_v60, %v2568_v25  ;;  %v1797_v61 = vpop.f32.mrb[11].mxu1  ;;  %v3024_v60 = vld [vmem:[%s3614_s12 + $0x90] ss:$8 sps:$4 sm:$0xff]  }
 0x53a   : > { %v1831_v63 = vadd.f32 %v2569_v57, %v1820_v59  ;;  %v1821_v0 = vmul.f32 %v2568_v25, %v1797_v61  ;;  %v3023_v25 = vld [vmem:[%s3614_s12 + $0x84] ss:$8 sps:$4 sm:$0xff]   ;;  %v3026_v59 = vld [vmem:[%s3614_s12 + $0x94] ss:$8 sps:$4 sm:$0xff]  }
 0x53b   : > { %v1841_v1 = vmul.f32 0.044715, %v1833_v27  ;;  %v1834_v2 = vadd.f32 %v2569_v57, %v1823_v28  ;;  %v1837_v24 = vmul.f32 0.5, %v1833_v27 }
 0x53c   : > { %v1839_v62 = vmul.f32 0.044715, %v1831_v63  ;;  %v1832_v3 = vadd.f32 %v2569_v57, %v1821_v0  ;;  %v1835_v31 = vmul.f32 0.5, %v1831_v63  ;;  %v3021_v57 = vld [vmem:[%s3614_s12 + $0x80] ss:$8 sps:$4 sm:$0xff]  }
 0x53d   : > { %v1845_v4 = vmul.f32 %v1841_v1, %v1833_v27  ;;  %v1842_v5 = vmul.f32 0.044715, %v1834_v2  ;;  %v1838_v35 = vmul.f32 0.5, %v1834_v2  ;;  %v3032_v1 = vld [vmem:[%s3614_s12 + $0xb4] ss:$8 sps:$4 sm:$0xff]  }
 0x53e   : > { %v1843_v6 = vmul.f32 %v1839_v62, %v1831_v63  ;;  %v1840_v7 = vmul.f32 0.044715, %v1832_v3  ;;  %v1836_v38 = vmul.f32 0.5, %v1832_v3 }
 0x53f   : > { %v1849_v8 = vmul.f32 %v1845_v4, %v1833_v27  ;;  %v1846_v9 = vmul.f32 %v1842_v5, %v1834_v2 }
 0x540   : > { %v1847_v10 = vmul.f32 %v1843_v6, %v1831_v63  ;;  %v1844_v11 = vmul.f32 %v1840_v7, %v1832_v3 }
 0x541   : > { %v1853_v12 = vadd.f32 %v1849_v8, %v1833_v27  ;;  %v1850_v13 = vmul.f32 %v1846_v9, %v1834_v2  ;;  %v3029_v27 = vld [vmem:[%s3614_s12 + $0xa4] ss:$8 sps:$4 sm:$0xff]   ;;  %v2226_v8 = vlaneseq }
 0x542   : > { %v1851_v14 = vadd.f32 %v1847_v10, %v1831_v63  ;;  %v1848_v15 = vmul.f32 %v1844_v11, %v1832_v3  ;;  %v3027_v63 = vld [vmem:[%s3614_s12 + $0xa0] ss:$8 sps:$4 sm:$0xff]  }
 0x543   : > { %v1857_v16 = vmul.f32 0.7978846, %v1853_v12  ;;  %v1854_v17 = vadd.f32 %v1850_v13, %v1834_v2  ;;  %v3030_v2 = vld [vmem:[%s3614_s12 + $0xb0] ss:$8 sps:$4 sm:$0xff]   ;;  %v2227_v9 = vshrl.u32 %v2226_v8, 7 }
 0x544   : > { %v1855_v18 = vmul.f32 0.7978846, %v1851_v14  ;;  %v1852_v19 = vadd.f32 %v1848_v15, %v1832_v3  ;;  %v2224_v11 = vld [vmem:[%s3615_s13] sm:$0x3] }
 0x545   : > { %3049 = vtanh.f32 %v1857_v16  ;;  %v1858_v20 = vmul.f32 0.7978846, %v1854_v17  ;;  %v2228_v10 = vsub.s32 0, %v2227_v9  ;;  %v2232_v12 = vsub.s32 1, %v2227_v9  ;;  %v2244_v13 = vld [vmem:[%s3616_s14] sm:$0x3] }
 0x546   : > { %3051 = vtanh.f32 %v1855_v18  ;;  %v1856_v21 = vmul.f32 0.7978846, %v1852_v19 }
 0x547   : > { %3053 = vtanh.f32 %v1858_v20  ;;  %v2229_v14 = vrot.slane %v2224_v11, %v2228_v10  ;;  %v2233_v15 = vrot.slane %v2224_v11, %v2232_v12  ;;  %v2253_v17 = vrot.slane %v2244_v13, %v2232_v12 }
 0x548   : > { %3055 = vtanh.f32 %v1856_v21 }
 0x54f   : > { %v3050_v22 = vpop.eup %3049 }
 0x550   : > { %v3052_v23 = vpop.eup %3051  ;;  %v1865_v29 = vadd.f32 1.0, %v3050_v22 }
 0x551   : > { %v3054_v30 = vpop.eup %3053  ;;  %v1863_v32 = vadd.f32 1.0, %v3052_v23 }
 0x552   : > { %v3056_v33 = vpop.eup %3055  ;;  %v1869_v34 = vmul.f32 %v1865_v29, %v1837_v24  ;;  %v1866_v36 = vadd.f32 1.0, %v3054_v30 }
 0x553   : > { %v1867_v37 = vmul.f32 %v1863_v32, %v1835_v31  ;;  %v1864_v39 = vadd.f32 1.0, %v3056_v33 }
 0x554   : > { %1873 = vst.msk [vmem:[#allocation3 + $0x11] sm:$0xff] %vm501_vm1, %v1869_v34  ;;  %v1870_v40 = vmul.f32 %v1866_v36, %v1838_v35 }
 0x555   : > { %1871 = vst.msk [vmem:[#allocation3 + $0x1] sm:$0xff] %vm501_vm1, %v1867_v37  ;;  %v1868_v41 = vmul.f32 %v1864_v39, %v1836_v38 }
 0x556   : > { %1874 = vst.msk [vmem:[#allocation3 + $0x19] sm:$0xff] %vm501_vm1, %v1870_v40 }
 0x557   : > { %1872 = vst.msk [vmem:[#allocation3 + $0x9] sm:$0xff] %vm501_vm1, %v1868_v41 }
 0x55b   : > { %v1891_v51 = vld [vmem:[#allocation3 + $0x11] sm:$0xff] }
 0x55c   : > { %v1889_v43 = vld [vmem:[#allocation3 + $0x1] sm:$0xff] }
 0x55d   : > { %v1892_v49 = vld [vmem:[#allocation3 + $0x19] sm:$0xff] }
 0x55e   : > { %v1890_v44 = vld [vmem:[#allocation3 + $0x9] sm:$0xff]  ;;  %v1894_v52 = vpack.c.bf16 %v1892_v49, %v1891_v51  ;;  %v1875_v26 = vld [vmem:[#allocation3] sm:$0xff]  ;;  %v1878_v61 = vld [vmem:[#allocation3 + $0x18] sm:$0xff] }
 0x55f   : > { %v1893_v45 = vpack.c.bf16 %v1890_v44, %v1889_v43  ;;  %v1876_v56 = vld [vmem:[#allocation3 + $0x8] sm:$0xff]  ;;  %v1877_v28 = vld [vmem:[#allocation3 + $0x10] sm:$0xff]  ;;  %v2105_v6 = vld [vmem:[#allocation3 + $0x1a] sm:$0xff] }
 0x560   : > { %v1879_v58 = vpack.c.bf16 %v1876_v56, %v1875_v26  ;;  %v1880_v0 = vpack.c.bf16 %v1878_v61, %v1877_v28  ;;  %v2102_v62 = vld [vmem:[#allocation3 + $0x2] sm:$0xff]  ;;  %v2103_v3 = vld [vmem:[#allocation3 + $0xa] sm:$0xff]  ;;  %v2104_v5 = vld [vmem:[#allocation3 + $0x12] sm:$0xff] }
 0x561   : > { %2586 = vmatmul.mubr.msk.bf16.vlgmr.msra.gmra.mrb[8].mxu0 %vm501_vm1, %v1893_v45  ;;  %v2106_v4 = vpack.c.bf16 %v2103_v3, %v2102_v62  ;;  %v2107_v7 = vpack.c.bf16 %v2105_v6, %v2104_v5 }
 0x562   : > { %2050 = vmatpush1.bf16.msra.mxu0 %v3009_v42  ;;  %1992 = vmatprep.mubr.bf16.mxu0 %v3082_v53 }
 0x563   : > { %2051 = vmatprep.subr.bf16.mxu0 %v3014_v46 }
 0x566   : > { %2052 = vmatpush1.bf16.msra.mxu0 %v3012_v47 }
 0x567   : > { %2053 = vmatprep.subr.bf16.mxu0 %v3017_v48 }
 0x569   : > { %2587 = vmatmul.mubr.msk.bf16.gmra.mrb[12].mxu0 %vm501_vm1, %v1894_v52 }
 0x56a   : > { %2054 = vmatpush1.bf16.msra.mxu0 %v3015_v50  ;;  %2081 = vmatprep.mubr.bf16.mxu0 %v3082_v53 }
 0x56b   : > { %2055 = vmatprep.subr.bf16.mxu0 %v3020_v54 }
 0x56e   : > { %2056 = vmatpush1.bf16.msra.mxu0 %v3018_v55 }
 0x56f   : > { %2163 = vmatprep.subr.bf16.mxu0 %v3023_v25 }
 0x571   : > { %2596 = vmatmul.mubr.msk.bf16.vlgmr.msra.gmra.mrb[8].mxu0 %vm501_vm1, %v1879_v58 }
 0x572   : > { %2164 = vmatpush1.bf16.msra.mxu0 %v3021_v57  ;;  %2091 = vmatprep.mubr.bf16.mxu0 %v3082_v53 }
 0x573   : > { %2165 = vmatprep.subr.bf16.mxu0 %v3026_v59 }
 0x576   : > { %2166 = vmatpush1.bf16.msra.mxu0 %v3024_v60 }
 0x577   : > { %2167 = vmatprep.subr.bf16.mxu0 %v3029_v27 }
 0x579   : > { %2597 = vmatmul.mubr.msk.bf16.gmra.mrb[12].mxu0 %vm501_vm1, %v1880_v0 }
 0x57a   : > { %2168 = vmatpush1.bf16.msra.mxu0 %v3027_v63  ;;  %2195 = vmatprep.mubr.bf16.mxu0 %v3082_v53 }
 0x57b   : > { %2169 = vmatprep.subr.bf16.mxu0 %v3032_v1 }
 0x57e   : > { %2170 = vmatpush1.bf16.msra.mxu0 %v3030_v2 }
 0x581   : > { %2614 = vmatmul.mubr.msk.bf16.vlgmr.msra.gmra.mrb[8].mxu0 %vm501_vm1, %v2106_v4 }
 0x582   : > { %2205 = vmatprep.mubr.bf16.mxu0 %v3082_v53  ;;  %v2249_v53 = vrot.slane %v2244_v13, %v2228_v10 }
 0x589   : > { %2615 = vmatmul.mubr.msk.bf16.gmra.mrb[12].mxu0 %vm501_vm1, %v2107_v7 }
 0x654   : > { %v2197_v16 = vpop.f32.mrb[8].mxu0 }
 0x655   : > { %v2236_v18 = vmul.f32 %v2229_v14, %v2197_v16  ;;  %v2199_v19 = vpop.f32.mrb[9].mxu0 }
 0x656   : > { %v2237_v20 = vmul.f32 %v2233_v15, %v2199_v19  ;;  %v2201_v21 = vpop.f32.mrb[10].mxu0 }
 0x657   : > { %v3543_v22 = vadd.f32 %v2249_v53, %v2236_v18  ;;  %v2238_v23 = vmul.f32 %v2229_v14, %v2201_v21  ;;  %v2203_v24 = vpop.f32.mrb[11].mxu0 }
 0x658   : > { %v3545_v29 = vadd.f32 %v2253_v17, %v2237_v20  ;;  %v2239_v30 = vmul.f32 %v2233_v15, %v2203_v24 }
 0x659   : > { %v2272_v31 = vmul.f32 0.044715, %v3543_v22  ;;  %v3548_v32 = vadd.f32 %v2249_v53, %v2238_v23  ;;  %v2264_v18 = vmul.f32 0.5, %v3543_v22 }
 0x65a   : > { %v2273_v33 = vmul.f32 0.044715, %v3545_v29  ;;  %v3551_v34 = vadd.f32 %v2253_v17, %v2239_v30  ;;  %v2265_v23 = vmul.f32 0.5, %v3545_v29 }
 0x65b   : > { %v2280_v35 = vmul.f32 %v2272_v31, %v3543_v22  ;;  %v2274_v36 = vmul.f32 0.044715, %v3548_v32 }
 0x65c   : > { %v2281_v37 = vmul.f32 %v2273_v33, %v3545_v29  ;;  %v2275_v38 = vmul.f32 0.044715, %v3551_v34  ;;  %v2207_v39 = vpop.f32.mrb[12].mxu0 }
 0x65d   : > { %v2288_v40 = vmul.f32 %v2280_v35, %v3543_v22  ;;  %v2282_v41 = vmul.f32 %v2274_v36, %v3548_v32  ;;  %v2240_v42 = vmul.f32 %v2229_v14, %v2207_v39  ;;  %v2209_v43 = vpop.f32.mrb[13].mxu0  ;;  %v2267_v36 = vmul.f32 0.5, %v3551_v34 }
 0x65e   : > { %v2289_v44 = vmul.f32 %v2281_v37, %v3545_v29  ;;  %v2283_v45 = vmul.f32 %v2275_v38, %v3551_v34  ;;  %v2241_v46 = vmul.f32 %v2233_v15, %v2209_v43  ;;  %v2211_v47 = vpop.f32.mrb[14].mxu0 }
 0x65f   : > { %v2296_v48 = vadd.f32 %v2288_v40, %v3543_v22  ;;  %v2290_v49 = vmul.f32 %v2282_v41, %v3548_v32  ;;  %v3563_v50 = vadd.f32 %v2249_v53, %v2240_v42  ;;  %v2242_v51 = vmul.f32 %v2229_v14, %v2211_v47  ;;  %v2213_v52 = vpop.f32.mrb[15].mxu0 }
 0x660   : > { %v2297_v54 = vadd.f32 %v2289_v44, %v3545_v29  ;;  %v2291_v55 = vmul.f32 %v2283_v45, %v3551_v34  ;;  %v3567_v25 = vadd.f32 %v2253_v17, %v2241_v46  ;;  %v2243_v56 = vmul.f32 %v2233_v15, %v2213_v52 }
 0x661   : > { %v2304_v57 = vmul.f32 0.7978846, %v2296_v48  ;;  %v2298_v26 = vadd.f32 %v2290_v49, %v3548_v32  ;;  %v2276_v58 = vmul.f32 0.044715, %v3563_v50  ;;  %v2262_v63 = vadd.f32 %v2249_v53, %v2242_v51 }
 0x662   : > { %v2305_v59 = vmul.f32 0.7978846, %v2297_v54  ;;  %v2299_v60 = vadd.f32 %v2291_v55, %v3551_v34  ;;  %v2277_v27 = vmul.f32 0.044715, %v3567_v25  ;;  %v2263_v2 = vadd.f32 %v2253_v17, %v2243_v56 }
 0x663   : > { %3057 = vtanh.f32 %v2304_v57  ;;  %v2306_v28 = vmul.f32 0.7978846, %v2298_v26  ;;  %v2284_v61 = vmul.f32 %v2276_v58, %v3563_v50  ;;  %v2278_v3 = vmul.f32 0.044715, %v2262_v63 }
 0x664   : > { %3059 = vtanh.f32 %v2305_v59  ;;  %v2307_v0 = vmul.f32 0.7978846, %v2299_v60  ;;  %v2285_v1 = vmul.f32 %v2277_v27, %v3567_v25  ;;  %v2279_v5 = vmul.f32 0.044715, %v2263_v2 }
 0x665   : > { %3061 = vtanh.f32 %v2306_v28  ;;  %v2292_v62 = vmul.f32 %v2284_v61, %v3563_v50  ;;  %v2286_v7 = vmul.f32 %v2278_v3, %v2262_v63  ;;  %v2266_v22 = vmul.f32 0.5, %v3548_v32 }
 0x666   : > { %3063 = vtanh.f32 %v2307_v0  ;;  %v2293_v4 = vmul.f32 %v2285_v1, %v3567_v25  ;;  %v2287_v9 = vmul.f32 %v2279_v5, %v2263_v2  ;;  %v2268_v41 = vmul.f32 0.5, %v3563_v50 }
 0x667   : > { %v2300_v6 = vadd.f32 %v2292_v62, %v3563_v50  ;;  %v2294_v11 = vmul.f32 %v2286_v7, %v2262_v63  ;;  %v2269_v42 = vmul.f32 0.5, %v3567_v25  ;;  %v2270_v47 = vmul.f32 0.5, %v2262_v63 }
 0x668   : > { %v2301_v8 = vadd.f32 %v2293_v4, %v3567_v25  ;;  %v2295_v13 = vmul.f32 %v2287_v9, %v2263_v2  ;;  %v2271_v49 = vmul.f32 0.5, %v2263_v2 }
 0x669   : > { %v2308_v10 = vmul.f32 0.7978846, %v2300_v6  ;;  %v2302_v14 = vadd.f32 %v2294_v11, %v2262_v63 }
 0x66a   : > { %v2309_v12 = vmul.f32 0.7978846, %v2301_v8  ;;  %v2303_v15 = vadd.f32 %v2295_v13, %v2263_v2 }
 0x66b   : > { %3065 = vtanh.f32 %v2308_v10  ;;  %v2310_v16 = vmul.f32 0.7978846, %v2302_v14 }
 0x66c   : > { %3067 = vtanh.f32 %v2309_v12  ;;  %v2311_v20 = vmul.f32 0.7978846, %v2303_v15 }
 0x66d   : > { %v3058_v53 = vpop.eup %3057  ;;  %3069 = vtanh.f32 %v2310_v16 }
 0x66e   : > { %v3060_v17 = vpop.eup %3059  ;;  %v2320_v19 = vadd.f32 1.0, %v3058_v53  ;;  %3071 = vtanh.f32 %v2311_v20 }
 0x66f   : > { %v3062_v21 = vpop.eup %3061  ;;  %v2321_v24 = vadd.f32 1.0, %v3060_v17 }
 0x670   : > { %v3064_v30 = vpop.eup %3063  ;;  %v2328_v31 = vmul.f32 %v2320_v19, %v2264_v18  ;;  %v2322_v33 = vadd.f32 1.0, %v3062_v21 }
 0x671   : > { %v2329_v35 = vmul.f32 %v2321_v24, %v2265_v23  ;;  %v2323_v37 = vadd.f32 1.0, %v3064_v30 }
 0x672   : > { %2336 = vst [vmem:[%s3584_s28] sm:$0xff] %v2328_v31  ;;  %v2330_v38 = vmul.f32 %v2322_v33, %v2266_v22 }
 0x673   : > { %2337 = vst [vmem:[%s3584_s28 + $0x8] sm:$0xff] %v2329_v35  ;;  %v2331_v39 = vmul.f32 %v2323_v37, %v2267_v36 }
 0x674   : > { %2338 = vst [vmem:[%s3584_s28 + $0x10] sm:$0xff] %v2330_v38 }
 0x675   : > { %v3066_v29 = vpop.eup %3065  ;;  %2339 = vst [vmem:[%s3584_s28 + $0x18] sm:$0xff] %v2331_v39 }
 0x676   : > { %v3068_v40 = vpop.eup %3067  ;;  %v2324_v32 = vadd.f32 1.0, %v3066_v29 }
 0x677   : > { %v2325_v43 = vadd.f32 1.0, %v3068_v40  ;;  %v3070_v44 = vpop.eup %3069 }
 0x678   : > { %v2332_v34 = vmul.f32 %v2324_v32, %v2268_v41  ;;  %v3072_v46 = vpop.eup %3071  ;;  %v2326_v48 = vadd.f32 1.0, %v3070_v44 }
 0x679   : > { %v2333_v45 = vmul.f32 %v2325_v43, %v2269_v42  ;;  %v2327_v51 = vadd.f32 1.0, %v3072_v46 }
 0x67a   : > { %2340 = vst [vmem:[%s3584_s28 + $0x20] sm:$0xff] %v2332_v34  ;;  %v2334_v52 = vmul.f32 %v2326_v48, %v2270_v47 }
 0x67b   : > { %2341 = vst [vmem:[%s3584_s28 + $0x28] sm:$0xff] %v2333_v45  ;;  %v2335_v54 = vmul.f32 %v2327_v51, %v2271_v49 }
 0x67c   : > { %2342 = vst [vmem:[%s3584_s28 + $0x30] sm:$0xff] %v2334_v52 }
 0x67d   : > { %2343 = vst [vmem:[%s3584_s28 + $0x38] sm:$0xff] %v2335_v54 }
 0x67e PF: > { %s25_s18 = sadd.s32 1, %s3079_s18  }
 0x67f   : > { %p22_p4 = scmp.ge.s32.totalorder %s25_s18, 4  }
 0x681   :  { %24 = sbr.rel (!%p22_p4) target bundleno = 1 (0x1), region = 118 }

</bundles_post_ra>
